<compile_context>
chip_gen: v7x
topology: tpu7x:2x2x1
jax: 0.10.0
libtpu: 0.0.40
codegen_flags: <defaults>
</compile_context>

<pallas_src>
import functools

import jax
import jax.numpy as jnp
from jax import lax
from jax.experimental import pallas as pl
from jax.experimental.pallas import tpu as pltpu


GATE_PAD = 128  # per-gate lane padding (H=48 -> 128 so gate slices are aligned)


def _sigmoid_via_tanh(x):
    # sigmoid(x) == 0.5 * tanh(0.5 * x) + 0.5 : single EUP push, no divide.
    return 0.5 * jnp.tanh(0.5 * x) + 0.5


# ----------------------------------------------------------------------------
# Fused kernel: LSTM recurrence + one-hot gather + MLP head, single invocation.
# ----------------------------------------------------------------------------
def _fused_lstm_sc_kernel(
    # ---- inputs -------------------------------------------------------------
    x2d_ref,    # (T*N, D)    time-major flattened input            [VMEM]
    wih_ref,    # (D, 4*HP)   input->gates, per-gate zero-padded    [VMEM]
    bg_ref,     # (1, 4*HP)   b_ih + b_hh, per-gate zero-padded     [VMEM]
    whh_hbm,    # (HP, 4*HP)  hidden->gates, zero-padded            [ANY/HBM]
    qcat_ref,   # (2E, 1)     int32 [q_from; q_to] indices          [VMEM]
    w1a_hbm,    # (HP, 128)   layer1 weights, q_from half (padded)  [ANY/HBM]
    w1b_hbm,    # (HP, 128)   layer1 weights, q_to   half (padded)  [ANY/HBM]
    b1_ref,     # (1, 128)                                          [VMEM]
    w2_ref,     # (128, 32)                                         [VMEM]
    b2_ref,     # (1, 32)                                           [VMEM]
    w3_ref,     # (1, 32)     final layer row vector                [VMEM]
    b3_ref,     # (1, 1)                                            [VMEM]
    # ---- outputs ------------------------------------------------------------
    out_ref,    # (E, 1)
    # ---- scratch ------------------------------------------------------------
    gates_sc,   # VMEM (T*N, 4*HP) hoisted input projection
    whh_sc,     # VMEM (HP, 4*HP)  DMA landing buffer
    w1a_sc,     # VMEM (HP, 128)   DMA landing buffer
    w1b_sc,     # VMEM (HP, 128)   DMA landing buffer
    dma_sem,    # DMA semaphores (3,)
    *, n_traj, t_steps, n_query, hp):
    f32 = jnp.float32
    zero = jnp.float32(0.0)
    one = jnp.float32(1.0)

    # ---- 0) Kick off the big weight DMAs so they overlap compute ------------
    whh_cp = pltpu.make_async_copy(whh_hbm, whh_sc, dma_sem.at[0])
    w1a_cp = pltpu.make_async_copy(w1a_hbm, w1a_sc, dma_sem.at[1])
    w1b_cp = pltpu.make_async_copy(w1b_hbm, w1b_sc, dma_sem.at[2])
    whh_cp.start()
    w1a_cp.start()
    w1b_cp.start()

    # ---- 1) Hoisted input projection (+ fused bias) for all timesteps -------
    gates_sc[...] = (
        jnp.dot(x2d_ref[...], wih_ref[...], preferred_element_type=f32)
        + bg_ref[...]
    )

    # ---- 2) Recurrence: h/c carried in vregs, loop fully unrolled -----------
    whh_cp.wait()  # W_hh needed from the first step onward.
    h = jnp.zeros((n_traj, hp), f32)
    c = jnp.zeros((n_traj, hp), f32)
    for ts in range(t_steps):
        g_in = gates_sc[ts * n_traj:(ts + 1) * n_traj, :]            # (N, 4*HP)
        # Loop-invariant VMEM RHS -> Mosaic may hoist the MXU weight push.
        gates = g_in + jnp.dot(h, whh_sc[...], preferred_element_type=f32)
        # PyTorch gate order: i, f, g, o — 128-lane-aligned slices.
        i_g = _sigmoid_via_tanh(gates[:, 0 * hp:1 * hp])
        f_g = _sigmoid_via_tanh(gates[:, 1 * hp:2 * hp])
        g_g = jnp.tanh(gates[:, 2 * hp:3 * hp])
        o_g = _sigmoid_via_tanh(gates[:, 3 * hp:4 * hp])
        c = f_g * c + i_g * g_g
        h = o_g * jnp.tanh(c)
        # Padded lanes: gate pads are 0 -> i=f=o=0.5, g=tanh(0)=0, so
        # c_pad stays 0 (0.5*0 + 0.5*0) and h_pad = 0.5*tanh(0) = 0.

    # ---- 3) Gather h[q_from], h[q_to] via ONE concatenated one-hot matmul ---
    e2 = 2 * n_query
    idx_n = lax.broadcasted_iota(jnp.int32, (e2, n_traj), 1)          # (2E, N)
    sel = jnp.where(idx_n == qcat_ref[...], one, zero)                # (2E, N)
    hcat = jnp.dot(sel, h, preferred_element_type=f32)                # (2E, HP)
    hf = hcat[:n_query, :]                                            # (E, HP)
    ht = hcat[n_query:, :]                                            # (E, HP)

    # ---- 4) MLP head: split first layer (no (E, 2H) union buffer) -----------
    w1a_cp.wait()
    w1b_cp.wait()
    f1 = (jnp.dot(hf, w1a_sc[...], preferred_element_type=f32)
          + jnp.dot(ht, w1b_sc[...], preferred_element_type=f32)
          + b1_ref[...])
    f1 = jnp.maximum(f1, zero)
    f2 = jnp.dot(f1, w2_ref[...], preferred_element_type=f32) + b2_ref[...]
    f2 = jnp.maximum(f2, zero)
    # 32 -> 1 projection as a VPU/XLU reduction (avoids a 1-lane matmul).
    logits = jnp.sum(f2 * w3_ref[...], axis=1, keepdims=True) + b3_ref[...]
    out_ref[...] = _sigmoid_via_tanh(logits)                          # (E, 1)


# ----------------------------------------------------------------------------
# One-time parameter packing (PyTorch layouts -> padded, kernel-friendly).
# ----------------------------------------------------------------------------
def pack_params(params):
    H = params["w_hh"].shape[1]
    HP = GATE_PAD
    assert H <= HP

    def pad_gate_cols(w):  # w: (4H, in) -> (in, 4*HP), zero-padded per gate
        in_dim = w.shape[1]
        out = jnp.zeros((in_dim, 4 * HP), jnp.float32)
        for g in range(4):
            out = out.at[:, g * HP:g * HP + H].set(w[g * H:(g + 1) * H, :].T)
        return out

    wih_p = pad_gate_cols(params["w_ih"])                          # (D, 4*HP)
    whh_p = jnp.zeros((HP, 4 * HP), jnp.float32).at[:H, :].set(
        pad_gate_cols(params["w_hh"]))                             # (HP, 4*HP)

    b = params["b_ih"] + params["b_hh"]                            # (4H,)
    bg_p = jnp.zeros((1, 4 * HP), jnp.float32)
    for g in range(4):
        bg_p = bg_p.at[0, g * HP:g * HP + H].set(b[g * H:(g + 1) * H])

    w1 = params["w1"]                                              # (128, 2H)
    w1a_t = jnp.zeros((HP, 128), jnp.float32).at[:H, :].set(w1[:, :H].T)
    w1b_t = jnp.zeros((HP, 128), jnp.float32).at[:H, :].set(w1[:, H:].T)

    return {
        "wih_p": wih_p,
        "whh_p": whh_p,
        "bg_p": bg_p,
        "w1a_t": w1a_t,
        "w1b_t": w1b_t,
        "b1_row": params["b1"].reshape(1, -1).astype(jnp.float32),
        "w2_t": params["w2"].T.astype(jnp.float32),                # (128, 32)
        "b2_row": params["b2"].reshape(1, -1).astype(jnp.float32),
        "w3_row": params["w3"].astype(jnp.float32),                # (1, 32)
        "b3": params["b3"].reshape(1, 1).astype(jnp.float32),
    }


# ----------------------------------------------------------------------------
# Forward pass: single pallas_call.
# ----------------------------------------------------------------------------
@jax.jit
def lstm_sc_pass_forward(packed, x, q_from, q_to):
    n, t, d = x.shape
    e = q_from.shape[0]
    hp = GATE_PAD

    # Time-major flatten so per-step rows are contiguous sublane slices.
    x2d = jnp.transpose(x, (1, 0, 2)).reshape(t * n, d)
    qcat = jnp.concatenate([q_from, q_to], axis=0).astype(jnp.int32)
    qcat = qcat.reshape(2 * e, 1)

    vmem = pl.BlockSpec(memory_space=pltpu.MemorySpace.VMEM)
    hbm = pl.BlockSpec(memory_space=pl.ANY)   # manual DMA inside the kernel
    kernel = functools.partial(
        _fused_lstm_sc_kernel, n_traj=n, t_steps=t, n_query=e, hp=hp)

    out = pl.pallas_call(
        kernel,
        out_shape=jax.ShapeDtypeStruct((e, 1), jnp.float32),
        in_specs=[
            vmem,  # x2d
            vmem,  # wih_p
            vmem,  # bg_p
            hbm,   # whh_p   (overlapped DMA)
            vmem,  # qcat
            hbm,   # w1a_t   (overlapped DMA)
            hbm,   # w1b_t   (overlapped DMA)
            vmem,  # b1_row
            vmem,  # w2_t
            vmem,  # b2_row
            vmem,  # w3_row
            vmem,  # b3
        ],
        out_specs=vmem,
        scratch_shapes=[
            pltpu.VMEM((t * n, 4 * hp), jnp.float32),   # gates_sc
            pltpu.VMEM((hp, 4 * hp), jnp.float32),      # whh landing buffer
            pltpu.VMEM((hp, 128), jnp.float32),         # w1a landing buffer
            pltpu.VMEM((hp, 128), jnp.float32),         # w1b landing buffer
            pltpu.SemaphoreType.DMA((3,)),
        ],
    )(
        x2d, packed["wih_p"], packed["bg_p"], packed["whh_p"], qcat,
        packed["w1a_t"], packed["w1b_t"], packed["b1_row"],
        packed["w2_t"], packed["b2_row"], packed["w3_row"], packed["b3"],
    )
    return out  # (E, 1)


# ----------------------------------------------------------------------------
# Pure-JAX reference for verification (original PyTorch layouts).
# ----------------------------------------------------------------------------
def reference_forward(params, x, q_from, q_to):
    N, T, D = x.shape
    H = params["w_hh"].shape[1]
    h = jnp.zeros((N, H), jnp.float32)
    c = jnp.zeros((N, H), jnp.float32)
    for t in range(T):
        gates = (x[:, t, :] @ params["w_ih"].T + h @ params["w_hh"].T
                 + params["b_ih"] + params["b_hh"])
        i = jax.nn.sigmoid(gates[:, 0 * H:1 * H])
        f = jax.nn.sigmoid(gates[:, 1 * H:2 * H])
        g = jnp.tanh(gates[:, 2 * H:3 * H])
        o = jax.nn.sigmoid(gates[:, 3 * H:4 * H])
        c = f * c + i * g
        h = o * jnp.tanh(c)
    union = jnp.concatenate([h[q_from], h[q_to]], axis=1)
    f1 = jax.nn.relu(union @ params["w1"].T + params["b1"])
    f2 = jax.nn.relu(f1 @ params["w2"].T + params["b2"])
    return jax.nn.sigmoid(f2 @ params["w3"].T + params["b3"])


def init_params(key, inp_dim=3, hidden=48):
    ks = jax.random.split(key, 10)

    def xavier(k, shape):
        fan_out, fan_in = shape
        std = (2.0 / (fan_in + fan_out)) ** 0.5
        return std * jax.random.normal(k, shape, jnp.float32)

    s = 1.0 / (hidden ** 0.5)
    return {
        # LSTM params (PyTorch layout: weights are (4H, in))
        "w_ih": jax.random.uniform(ks[0], (4 * hidden, inp_dim), jnp.float32, -s, s),
        "w_hh": jax.random.uniform(ks[1], (4 * hidden, hidden), jnp.float32, -s, s),
        "b_ih": jax.random.uniform(ks[2], (4 * hidden,), jnp.float32, -s, s),
        "b_hh": jax.random.uniform(ks[3], (4 * hidden,), jnp.float32, -s, s),
        # MLP head (PyTorch nn.Linear layout: (out, in))
        "w1": xavier(ks[4], (128, 2 * hidden)),
        "b1": jnp.zeros((128,), jnp.float32),
        "w2": xavier(ks[5], (32, 128)),
        "b2": jnp.zeros((32,), jnp.float32),
        "w3": xavier(ks[6], (1, 32)),
        "b3": jnp.zeros((1,), jnp.float32),
    }


if __name__ == "__main__":
    key = jax.random.PRNGKey(0)
    k_param, k_x, k_qf, k_qt = jax.random.split(key, 4)

    N, T, D, H = 8, 8, 3, 48   # trajectories, timesteps, input dim, lstm hidden
    E = 16                     # number of query pairs

    params = init_params(k_param, inp_dim=D, hidden=H)
    packed = pack_params(params)   # one-time packing (done outside the hot path)

    x = jax.random.normal(k_x, (N, T, D), jnp.float32)
    q_from = jax.random.randint(k_qf, (E,), 0, N)
    q_to = jax.random.randint(k_qt, (E,), 0, N)

    out = lstm_sc_pass_forward(packed, x, q_from, q_to)
    out = jax.block_until_ready(out)

    ref = reference_forward(params, x, q_from, q_to)
    assert out.shape == (E, 1)
    max_diff = jnp.max(jnp.abs(out - ref))
    assert jnp.allclose(out, ref, atol=2e-5, rtol=2e-5), (
        f"mismatch: max abs diff {max_diff}"
    )

    print("KERNEL_OK")
</pallas_src>

<mosaic_0001>
module attributes {stable_mosaic.version = 11 : i64} {
  func.func @_fused_lstm_sc_kernel(%arg0: memref<64x3xf32, #tpu.memory_space<vmem>>, %arg1: memref<3x512xf32, #tpu.memory_space<vmem>>, %arg2: memref<1x512xf32, #tpu.memory_space<vmem>>, %arg3: memref<128x512xf32, #tpu.memory_space<any>>, %arg4: memref<32x1xi32, #tpu.memory_space<vmem>>, %arg5: memref<128x128xf32, #tpu.memory_space<any>>, %arg6: memref<128x128xf32, #tpu.memory_space<any>>, %arg7: memref<1x128xf32, #tpu.memory_space<vmem>>, %arg8: memref<128x32xf32, #tpu.memory_space<vmem>>, %arg9: memref<1x32xf32, #tpu.memory_space<vmem>>, %arg10: memref<1x32xf32, #tpu.memory_space<vmem>>, %arg11: memref<1x1xf32, #tpu.memory_space<vmem>>, %arg12: memref<16x1xf32, #tpu.memory_space<vmem>>, %arg13: memref<64x512xf32, #tpu.memory_space<vmem>>, %arg14: memref<128x512xf32, #tpu.memory_space<vmem>>, %arg15: memref<128x128xf32, #tpu.memory_space<vmem>>, %arg16: memref<128x128xf32, #tpu.memory_space<vmem>>, %arg17: memref<3x!tpu.dma_semaphore, #tpu.memory_space<semaphore_mem>>) attributes {dimension_semantics = [], scalar_prefetch = 0 : i64, scratch_operands = 5 : i64, tpu.core_type = #tpu.core_type<tc>} {
    %c0_i32 = arith.constant 0 : i32
    %0 = tpu.memref_slice %arg17[%c0_i32] : memref<3x!tpu.dma_semaphore, #tpu.memory_space<semaphore_mem>> -> memref<1x!tpu.dma_semaphore, #tpu.memory_space<semaphore_mem>>
    %1 = tpu.memref_squeeze %0 : memref<1x!tpu.dma_semaphore, #tpu.memory_space<semaphore_mem>> -> memref<!tpu.dma_semaphore, #tpu.memory_space<semaphore_mem>>
    tpu.enqueue_dma source(%arg3 : memref<128x512xf32, #tpu.memory_space<any>>) target(%arg14 : memref<128x512xf32, #tpu.memory_space<vmem>>) target_semaphore(%1 : memref<!tpu.dma_semaphore, #tpu.memory_space<semaphore_mem>>)
    %c1_i32 = arith.constant 1 : i32
    %2 = tpu.memref_slice %arg17[%c1_i32] : memref<3x!tpu.dma_semaphore, #tpu.memory_space<semaphore_mem>> -> memref<1x!tpu.dma_semaphore, #tpu.memory_space<semaphore_mem>>
    %3 = tpu.memref_squeeze %2 : memref<1x!tpu.dma_semaphore, #tpu.memory_space<semaphore_mem>> -> memref<!tpu.dma_semaphore, #tpu.memory_space<semaphore_mem>>
    tpu.enqueue_dma source(%arg5 : memref<128x128xf32, #tpu.memory_space<any>>) target(%arg15 : memref<128x128xf32, #tpu.memory_space<vmem>>) target_semaphore(%3 : memref<!tpu.dma_semaphore, #tpu.memory_space<semaphore_mem>>)
    %c2_i32 = arith.constant 2 : i32
    %4 = tpu.memref_slice %arg17[%c2_i32] : memref<3x!tpu.dma_semaphore, #tpu.memory_space<semaphore_mem>> -> memref<1x!tpu.dma_semaphore, #tpu.memory_space<semaphore_mem>>
    %5 = tpu.memref_squeeze %4 : memref<1x!tpu.dma_semaphore, #tpu.memory_space<semaphore_mem>> -> memref<!tpu.dma_semaphore, #tpu.memory_space<semaphore_mem>>
    tpu.enqueue_dma source(%arg6 : memref<128x128xf32, #tpu.memory_space<any>>) target(%arg16 : memref<128x128xf32, #tpu.memory_space<vmem>>) target_semaphore(%5 : memref<!tpu.dma_semaphore, #tpu.memory_space<semaphore_mem>>)
    %c0 = arith.constant 0 : index
    %c0_0 = arith.constant 0 : index
    %6 = vector.load %arg0[%c0, %c0_0] : memref<64x3xf32, #tpu.memory_space<vmem>>, vector<64x3xf32>
    %c0_1 = arith.constant 0 : index
    %c0_2 = arith.constant 0 : index
    %7 = vector.load %arg1[%c0_1, %c0_2] : memref<3x512xf32, #tpu.memory_space<vmem>>, vector<3x512xf32>
    %cst = arith.constant dense<0.000000e+00> : vector<64x512xf32>
    %8 = tpu.matmul %6, %7, %cst {dimension_numbers = #tpu.dot_dimension_numbers<[1], [0], [0], [1], [0, 0, 1, 1], [], []>} : vector<64x3xf32>, vector<3x512xf32>, vector<64x512xf32> -> vector<64x512xf32>
    %c0_3 = arith.constant 0 : index
    %c0_4 = arith.constant 0 : index
    %9 = vector.load %arg2[%c0_3, %c0_4] : memref<1x512xf32, #tpu.memory_space<vmem>>, vector<1x512xf32>
    %10 = vector.broadcast %9 : vector<1x512xf32> to vector<64x512xf32>
    %11 = arith.addf %8, %10 : vector<64x512xf32>
    %c0_5 = arith.constant 0 : index
    %c0_6 = arith.constant 0 : index
    %12 = vector.load %arg13[%c0_5, %c0_6] : memref<64x512xf32, #tpu.memory_space<vmem>>, vector<64x512xf32>
    tpu.vector_store %arg13[%c0_5, %c0_6], %11 {strides = array<i32>} : memref<64x512xf32, #tpu.memory_space<vmem>>, vector<64x512xf32>,
    %c0_i32_7 = arith.constant 0 : i32
    %13 = tpu.memref_slice %arg17[%c0_i32_7] : memref<3x!tpu.dma_semaphore, #tpu.memory_space<semaphore_mem>> -> memref<1x!tpu.dma_semaphore, #tpu.memory_space<semaphore_mem>>
    %14 = tpu.memref_squeeze %13 : memref<1x!tpu.dma_semaphore, #tpu.memory_space<semaphore_mem>> -> memref<!tpu.dma_semaphore, #tpu.memory_space<semaphore_mem>>
    tpu.wait_dma2 semaphore(%14 : memref<!tpu.dma_semaphore, #tpu.memory_space<semaphore_mem>>) src(%arg3 : memref<128x512xf32, #tpu.memory_space<any>>) dst(%arg14 : memref<128x512xf32, #tpu.memory_space<vmem>>)
    %cst_8 = arith.constant 0.000000e+00 : f32
    %15 = vector.broadcast %cst_8 : f32 to vector<8x128xf32>
    %cst_9 = arith.constant 0.000000e+00 : f32
    %16 = vector.broadcast %cst_9 : f32 to vector<8x128xf32>
    %c0_10 = arith.constant 0 : index
    %c0_11 = arith.constant 0 : index
    %17 = vector.load %arg13[%c0_10, %c0_11] : memref<64x512xf32, #tpu.memory_space<vmem>>, vector<8x512xf32>
    %c0_12 = arith.constant 0 : index
    %c0_13 = arith.constant 0 : index
    %18 = vector.load %arg14[%c0_12, %c0_13] : memref<128x512xf32, #tpu.memory_space<vmem>>, vector<128x512xf32>
    %cst_14 = arith.constant dense<0.000000e+00> : vector<8x512xf32>
    %19 = tpu.matmul %15, %18, %cst_14 {dimension_numbers = #tpu.dot_dimension_numbers<[1], [0], [0], [1], [0, 0, 1, 1], [], []>} : vector<8x128xf32>, vector<128x512xf32>, vector<8x512xf32> -> vector<8x512xf32>
    %20 = arith.addf %17, %19 : vector<8x512xf32>
    %21 = vector.extract_strided_slice %20 {offsets = [0, 0], sizes = [8, 128], strides = [1, 1]} : vector<8x512xf32> to vector<8x128xf32>
    %cst_15 = arith.constant 5.000000e-01 : f32
    %22 = vector.broadcast %cst_15 : f32 to vector<8x128xf32>
    %23 = arith.mulf %22, %21 : vector<8x128xf32>
    %24 = math.tanh %23 : vector<8x128xf32>
    %cst_16 = arith.constant 5.000000e-01 : f32
    %25 = vector.broadcast %cst_16 : f32 to vector<8x128xf32>
    %26 = arith.mulf %25, %24 : vector<8x128xf32>
    %cst_17 = arith.constant 5.000000e-01 : f32
    %27 = vector.broadcast %cst_17 : f32 to vector<8x128xf32>
    %28 = arith.addf %26, %27 : vector<8x128xf32>
    %29 = vector.extract_strided_slice %20 {offsets = [0, 128], sizes = [8, 128], strides = [1, 1]} : vector<8x512xf32> to vector<8x128xf32>
    %cst_18 = arith.constant 5.000000e-01 : f32
    %30 = vector.broadcast %cst_18 : f32 to vector<8x128xf32>
    %31 = arith.mulf %30, %29 : vector<8x128xf32>
    %32 = math.tanh %31 : vector<8x128xf32>
    %cst_19 = arith.constant 5.000000e-01 : f32
    %33 = vector.broadcast %cst_19 : f32 to vector<8x128xf32>
    %34 = arith.mulf %33, %32 : vector<8x128xf32>
    %cst_20 = arith.constant 5.000000e-01 : f32
    %35 = vector.broadcast %cst_20 : f32 to vector<8x128xf32>
    %36 = arith.addf %34, %35 : vector<8x128xf32>
    %37 = vector.extract_strided_slice %20 {offsets = [0, 256], sizes = [8, 128], strides = [1, 1]} : vector<8x512xf32> to vector<8x128xf32>
    %38 = math.tanh %37 : vector<8x128xf32>
    %39 = vector.extract_strided_slice %20 {offsets = [0, 384], sizes = [8, 128], strides = [1, 1]} : vector<8x512xf32> to vector<8x128xf32>
    %cst_21 = arith.constant 5.000000e-01 : f32
    %40 = vector.broadcast %cst_21 : f32 to vector<8x128xf32>
    %41 = arith.mulf %40, %39 : vector<8x128xf32>
    %42 = math.tanh %41 : vector<8x128xf32>
    %cst_22 = arith.constant 5.000000e-01 : f32
    %43 = vector.broadcast %cst_22 : f32 to vector<8x128xf32>
    %44 = arith.mulf %43, %42 : vector<8x128xf32>
    %cst_23 = arith.constant 5.000000e-01 : f32
    %45 = vector.broadcast %cst_23 : f32 to vector<8x128xf32>
    %46 = arith.addf %44, %45 : vector<8x128xf32>
    %47 = arith.mulf %36, %16 : vector<8x128xf32>
    %48 = arith.mulf %28, %38 : vector<8x128xf32>
    %49 = arith.addf %47, %48 : vector<8x128xf32>
    %50 = math.tanh %49 : vector<8x128xf32>
    %51 = arith.mulf %46, %50 : vector<8x128xf32>
    %c8 = arith.constant 8 : index
    %c0_24 = arith.constant 0 : index
    %52 = vector.load %arg13[%c8, %c0_24] : memref<64x512xf32, #tpu.memory_space<vmem>>, vector<8x512xf32>
    %c0_25 = arith.constant 0 : index
    %c0_26 = arith.constant 0 : index
    %53 = vector.load %arg14[%c0_25, %c0_26] : memref<128x512xf32, #tpu.memory_space<vmem>>, vector<128x512xf32>
    %cst_27 = arith.constant dense<0.000000e+00> : vector<8x512xf32>
    %54 = tpu.matmul %51, %53, %cst_27 {dimension_numbers = #tpu.dot_dimension_numbers<[1], [0], [0], [1], [0, 0, 1, 1], [], []>} : vector<8x128xf32>, vector<128x512xf32>, vector<8x512xf32> -> vector<8x512xf32>
    %55 = arith.addf %52, %54 : vector<8x512xf32>
    %56 = vector.extract_strided_slice %55 {offsets = [0, 0], sizes = [8, 128], strides = [1, 1]} : vector<8x512xf32> to vector<8x128xf32>
    %cst_28 = arith.constant 5.000000e-01 : f32
    %57 = vector.broadcast %cst_28 : f32 to vector<8x128xf32>
    %58 = arith.mulf %57, %56 : vector<8x128xf32>
    %59 = math.tanh %58 : vector<8x128xf32>
    %cst_29 = arith.constant 5.000000e-01 : f32
    %60 = vector.broadcast %cst_29 : f32 to vector<8x128xf32>
    %61 = arith.mulf %60, %59 : vector<8x128xf32>
    %cst_30 = arith.constant 5.000000e-01 : f32
    %62 = vector.broadcast %cst_30 : f32 to vector<8x128xf32>
    %63 = arith.addf %61, %62 : vector<8x128xf32>
    %64 = vector.extract_strided_slice %55 {offsets = [0, 128], sizes = [8, 128], strides = [1, 1]} : vector<8x512xf32> to vector<8x128xf32>
    %cst_31 = arith.constant 5.000000e-01 : f32
    %65 = vector.broadcast %cst_31 : f32 to vector<8x128xf32>
    %66 = arith.mulf %65, %64 : vector<8x128xf32>
    %67 = math.tanh %66 : vector<8x128xf32>
    %cst_32 = arith.constant 5.000000e-01 : f32
    %68 = vector.broadcast %cst_32 : f32 to vector<8x128xf32>
    %69 = arith.mulf %68, %67 : vector<8x128xf32>
    %cst_33 = arith.constant 5.000000e-01 : f32
    %70 = vector.broadcast %cst_33 : f32 to vector<8x128xf32>
    %71 = arith.addf %69, %70 : vector<8x128xf32>
    %72 = vector.extract_strided_slice %55 {offsets = [0, 256], sizes = [8, 128], strides = [1, 1]} : vector<8x512xf32> to vector<8x128xf32>
    %73 = math.tanh %72 : vector<8x128xf32>
    %74 = vector.extract_strided_slice %55 {offsets = [0, 384], sizes = [8, 128], strides = [1, 1]} : vector<8x512xf32> to vector<8x128xf32>
    %cst_34 = arith.constant 5.000000e-01 : f32
    %75 = vector.broadcast %cst_34 : f32 to vector<8x128xf32>
    %76 = arith.mulf %75, %74 : vector<8x128xf32>
    %77 = math.tanh %76 : vector<8x128xf32>
    %cst_35 = arith.constant 5.000000e-01 : f32
    %78 = vector.broadcast %cst_35 : f32 to vector<8x128xf32>
    %79 = arith.mulf %78, %77 : vector<8x128xf32>
    %cst_36 = arith.constant 5.000000e-01 : f32
    %80 = vector.broadcast %cst_36 : f32 to vector<8x128xf32>
    %81 = arith.addf %79, %80 : vector<8x128xf32>
    %82 = arith.mulf %71, %49 : vector<8x128xf32>
    %83 = arith.mulf %63, %73 : vector<8x128xf32>
    %84 = arith.addf %82, %83 : vector<8x128xf32>
    %85 = math.tanh %84 : vector<8x128xf32>
    %86 = arith.mulf %81, %85 : vector<8x128xf32>
    %c16 = arith.constant 16 : index
    %c0_37 = arith.constant 0 : index
    %87 = vector.load %arg13[%c16, %c0_37] : memref<64x512xf32, #tpu.memory_space<vmem>>, vector<8x512xf32>
    %c0_38 = arith.constant 0 : index
    %c0_39 = arith.constant 0 : index
    %88 = vector.load %arg14[%c0_38, %c0_39] : memref<128x512xf32, #tpu.memory_space<vmem>>, vector<128x512xf32>
    %cst_40 = arith.constant dense<0.000000e+00> : vector<8x512xf32>
    %89 = tpu.matmul %86, %88, %cst_40 {dimension_numbers = #tpu.dot_dimension_numbers<[1], [0], [0], [1], [0, 0, 1, 1], [], []>} : vector<8x128xf32>, vector<128x512xf32>, vector<8x512xf32> -> vector<8x512xf32>
    %90 = arith.addf %87, %89 : vector<8x512xf32>
    %91 = vector.extract_strided_slice %90 {offsets = [0, 0], sizes = [8, 128], strides = [1, 1]} : vector<8x512xf32> to vector<8x128xf32>
    %cst_41 = arith.constant 5.000000e-01 : f32
    %92 = vector.broadcast %cst_41 : f32 to vector<8x128xf32>
    %93 = arith.mulf %92, %91 : vector<8x128xf32>
    %94 = math.tanh %93 : vector<8x128xf32>
    %cst_42 = arith.constant 5.000000e-01 : f32
    %95 = vector.broadcast %cst_42 : f32 to vector<8x128xf32>
    %96 = arith.mulf %95, %94 : vector<8x128xf32>
    %cst_43 = arith.constant 5.000000e-01 : f32
    %97 = vector.broadcast %cst_43 : f32 to vector<8x128xf32>
    %98 = arith.addf %96, %97 : vector<8x128xf32>
    %99 = vector.extract_strided_slice %90 {offsets = [0, 128], sizes = [8, 128], strides = [1, 1]} : vector<8x512xf32> to vector<8x128xf32>
    %cst_44 = arith.constant 5.000000e-01 : f32
    %100 = vector.broadcast %cst_44 : f32 to vector<8x128xf32>
    %101 = arith.mulf %100, %99 : vector<8x128xf32>
    %102 = math.tanh %101 : vector<8x128xf32>
    %cst_45 = arith.constant 5.000000e-01 : f32
    %103 = vector.broadcast %cst_45 : f32 to vector<8x128xf32>
    %104 = arith.mulf %103, %102 : vector<8x128xf32>
    %cst_46 = arith.constant 5.000000e-01 : f32
    %105 = vector.broadcast %cst_46 : f32 to vector<8x128xf32>
    %106 = arith.addf %104, %105 : vector<8x128xf32>
    %107 = vector.extract_strided_slice %90 {offsets = [0, 256], sizes = [8, 128], strides = [1, 1]} : vector<8x512xf32> to vector<8x128xf32>
    %108 = math.tanh %107 : vector<8x128xf32>
    %109 = vector.extract_strided_slice %90 {offsets = [0, 384], sizes = [8, 128], strides = [1, 1]} : vector<8x512xf32> to vector<8x128xf32>
    %cst_47 = arith.constant 5.000000e-01 : f32
    %110 = vector.broadcast %cst_47 : f32 to vector<8x128xf32>
    %111 = arith.mulf %110, %109 : vector<8x128xf32>
    %112 = math.tanh %111 : vector<8x128xf32>
    %cst_48 = arith.constant 5.000000e-01 : f32
    %113 = vector.broadcast %cst_48 : f32 to vector<8x128xf32>
    %114 = arith.mulf %113, %112 : vector<8x128xf32>
    %cst_49 = arith.constant 5.000000e-01 : f32
    %115 = vector.broadcast %cst_49 : f32 to vector<8x128xf32>
    %116 = arith.addf %114, %115 : vector<8x128xf32>
    %117 = arith.mulf %106, %84 : vector<8x128xf32>
    %118 = arith.mulf %98, %108 : vector<8x128xf32>
    %119 = arith.addf %117, %118 : vector<8x128xf32>
    %120 = math.tanh %119 : vector<8x128xf32>
    %121 = arith.mulf %116, %120 : vector<8x128xf32>
    %c24 = arith.constant 24 : index
    %c0_50 = arith.constant 0 : index
    %122 = vector.load %arg13[%c24, %c0_50] : memref<64x512xf32, #tpu.memory_space<vmem>>, vector<8x512xf32>
    %c0_51 = arith.constant 0 : index
    %c0_52 = arith.constant 0 : index
    %123 = vector.load %arg14[%c0_51, %c0_52] : memref<128x512xf32, #tpu.memory_space<vmem>>, vector<128x512xf32>
    %cst_53 = arith.constant dense<0.000000e+00> : vector<8x512xf32>
    %124 = tpu.matmul %121, %123, %cst_53 {dimension_numbers = #tpu.dot_dimension_numbers<[1], [0], [0], [1], [0, 0, 1, 1], [], []>} : vector<8x128xf32>, vector<128x512xf32>, vector<8x512xf32> -> vector<8x512xf32>
    %125 = arith.addf %122, %124 : vector<8x512xf32>
    %126 = vector.extract_strided_slice %125 {offsets = [0, 0], sizes = [8, 128], strides = [1, 1]} : vector<8x512xf32> to vector<8x128xf32>
    %cst_54 = arith.constant 5.000000e-01 : f32
    %127 = vector.broadcast %cst_54 : f32 to vector<8x128xf32>
    %128 = arith.mulf %127, %126 : vector<8x128xf32>
    %129 = math.tanh %128 : vector<8x128xf32>
    %cst_55 = arith.constant 5.000000e-01 : f32
    %130 = vector.broadcast %cst_55 : f32 to vector<8x128xf32>
    %131 = arith.mulf %130, %129 : vector<8x128xf32>
    %cst_56 = arith.constant 5.000000e-01 : f32
    %132 = vector.broadcast %cst_56 : f32 to vector<8x128xf32>
    %133 = arith.addf %131, %132 : vector<8x128xf32>
    %134 = vector.extract_strided_slice %125 {offsets = [0, 128], sizes = [8, 128], strides = [1, 1]} : vector<8x512xf32> to vector<8x128xf32>
    %cst_57 = arith.constant 5.000000e-01 : f32
    %135 = vector.broadcast %cst_57 : f32 to vector<8x128xf32>
    %136 = arith.mulf %135, %134 : vector<8x128xf32>
    %137 = math.tanh %136 : vector<8x128xf32>
    %cst_58 = arith.constant 5.000000e-01 : f32
    %138 = vector.broadcast %cst_58 : f32 to vector<8x128xf32>
    %139 = arith.mulf %138, %137 : vector<8x128xf32>
    %cst_59 = arith.constant 5.000000e-01 : f32
    %140 = vector.broadcast %cst_59 : f32 to vector<8x128xf32>
    %141 = arith.addf %139, %140 : vector<8x128xf32>
    %142 = vector.extract_strided_slice %125 {offsets = [0, 256], sizes = [8, 128], strides = [1, 1]} : vector<8x512xf32> to vector<8x128xf32>
    %143 = math.tanh %142 : vector<8x128xf32>
    %144 = vector.extract_strided_slice %125 {offsets = [0, 384], sizes = [8, 128], strides = [1, 1]} : vector<8x512xf32> to vector<8x128xf32>
    %cst_60 = arith.constant 5.000000e-01 : f32
    %145 = vector.broadcast %cst_60 : f32 to vector<8x128xf32>
    %146 = arith.mulf %145, %144 : vector<8x128xf32>
    %147 = math.tanh %146 : vector<8x128xf32>
    %cst_61 = arith.constant 5.000000e-01 : f32
    %148 = vector.broadcast %cst_61 : f32 to vector<8x128xf32>
    %149 = arith.mulf %148, %147 : vector<8x128xf32>
    %cst_62 = arith.constant 5.000000e-01 : f32
    %150 = vector.broadcast %cst_62 : f32 to vector<8x128xf32>
    %151 = arith.addf %149, %150 : vector<8x128xf32>
    %152 = arith.mulf %141, %119 : vector<8x128xf32>
    %153 = arith.mulf %133, %143 : vector<8x128xf32>
    %154 = arith.addf %152, %153 : vector<8x128xf32>
    %155 = math.tanh %154 : vector<8x128xf32>
    %156 = arith.mulf %151, %155 : vector<8x128xf32>
    %c32 = arith.constant 32 : index
    %c0_63 = arith.constant 0 : index
    %157 = vector.load %arg13[%c32, %c0_63] : memref<64x512xf32, #tpu.memory_space<vmem>>, vector<8x512xf32>
    %c0_64 = arith.constant 0 : index
    %c0_65 = arith.constant 0 : index
    %158 = vector.load %arg14[%c0_64, %c0_65] : memref<128x512xf32, #tpu.memory_space<vmem>>, vector<128x512xf32>
    %cst_66 = arith.constant dense<0.000000e+00> : vector<8x512xf32>
    %159 = tpu.matmul %156, %158, %cst_66 {dimension_numbers = #tpu.dot_dimension_numbers<[1], [0], [0], [1], [0, 0, 1, 1], [], []>} : vector<8x128xf32>, vector<128x512xf32>, vector<8x512xf32> -> vector<8x512xf32>
    %160 = arith.addf %157, %159 : vector<8x512xf32>
    %161 = vector.extract_strided_slice %160 {offsets = [0, 0], sizes = [8, 128], strides = [1, 1]} : vector<8x512xf32> to vector<8x128xf32>
    %cst_67 = arith.constant 5.000000e-01 : f32
    %162 = vector.broadcast %cst_67 : f32 to vector<8x128xf32>
    %163 = arith.mulf %162, %161 : vector<8x128xf32>
    %164 = math.tanh %163 : vector<8x128xf32>
    %cst_68 = arith.constant 5.000000e-01 : f32
    %165 = vector.broadcast %cst_68 : f32 to vector<8x128xf32>
    %166 = arith.mulf %165, %164 : vector<8x128xf32>
    %cst_69 = arith.constant 5.000000e-01 : f32
    %167 = vector.broadcast %cst_69 : f32 to vector<8x128xf32>
    %168 = arith.addf %166, %167 : vector<8x128xf32>
    %169 = vector.extract_strided_slice %160 {offsets = [0, 128], sizes = [8, 128], strides = [1, 1]} : vector<8x512xf32> to vector<8x128xf32>
    %cst_70 = arith.constant 5.000000e-01 : f32
    %170 = vector.broadcast %cst_70 : f32 to vector<8x128xf32>
    %171 = arith.mulf %170, %169 : vector<8x128xf32>
    %172 = math.tanh %171 : vector<8x128xf32>
    %cst_71 = arith.constant 5.000000e-01 : f32
    %173 = vector.broadcast %cst_71 : f32 to vector<8x128xf32>
    %174 = arith.mulf %173, %172 : vector<8x128xf32>
    %cst_72 = arith.constant 5.000000e-01 : f32
    %175 = vector.broadcast %cst_72 : f32 to vector<8x128xf32>
    %176 = arith.addf %174, %175 : vector<8x128xf32>
    %177 = vector.extract_strided_slice %160 {offsets = [0, 256], sizes = [8, 128], strides = [1, 1]} : vector<8x512xf32> to vector<8x128xf32>
    %178 = math.tanh %177 : vector<8x128xf32>
    %179 = vector.extract_strided_slice %160 {offsets = [0, 384], sizes = [8, 128], strides = [1, 1]} : vector<8x512xf32> to vector<8x128xf32>
    %cst_73 = arith.constant 5.000000e-01 : f32
    %180 = vector.broadcast %cst_73 : f32 to vector<8x128xf32>
    %181 = arith.mulf %180, %179 : vector<8x128xf32>
    %182 = math.tanh %181 : vector<8x128xf32>
    %cst_74 = arith.constant 5.000000e-01 : f32
    %183 = vector.broadcast %cst_74 : f32 to vector<8x128xf32>
    %184 = arith.mulf %183, %182 : vector<8x128xf32>
    %cst_75 = arith.constant 5.000000e-01 : f32
    %185 = vector.broadcast %cst_75 : f32 to vector<8x128xf32>
    %186 = arith.addf %184, %185 : vector<8x128xf32>
    %187 = arith.mulf %176, %154 : vector<8x128xf32>
    %188 = arith.mulf %168, %178 : vector<8x128xf32>
    %189 = arith.addf %187, %188 : vector<8x128xf32>
    %190 = math.tanh %189 : vector<8x128xf32>
    %191 = arith.mulf %186, %190 : vector<8x128xf32>
    %c40 = arith.constant 40 : index
    %c0_76 = arith.constant 0 : index
    %192 = vector.load %arg13[%c40, %c0_76] : memref<64x512xf32, #tpu.memory_space<vmem>>, vector<8x512xf32>
    %c0_77 = arith.constant 0 : index
    %c0_78 = arith.constant 0 : index
    %193 = vector.load %arg14[%c0_77, %c0_78] : memref<128x512xf32, #tpu.memory_space<vmem>>, vector<128x512xf32>
    %cst_79 = arith.constant dense<0.000000e+00> : vector<8x512xf32>
    %194 = tpu.matmul %191, %193, %cst_79 {dimension_numbers = #tpu.dot_dimension_numbers<[1], [0], [0], [1], [0, 0, 1, 1], [], []>} : vector<8x128xf32>, vector<128x512xf32>, vector<8x512xf32> -> vector<8x512xf32>
    %195 = arith.addf %192, %194 : vector<8x512xf32>
    %196 = vector.extract_strided_slice %195 {offsets = [0, 0], sizes = [8, 128], strides = [1, 1]} : vector<8x512xf32> to vector<8x128xf32>
    %cst_80 = arith.constant 5.000000e-01 : f32
    %197 = vector.broadcast %cst_80 : f32 to vector<8x128xf32>
    %198 = arith.mulf %197, %196 : vector<8x128xf32>
    %199 = math.tanh %198 : vector<8x128xf32>
    %cst_81 = arith.constant 5.000000e-01 : f32
    %200 = vector.broadcast %cst_81 : f32 to vector<8x128xf32>
    %201 = arith.mulf %200, %199 : vector<8x128xf32>
    %cst_82 = arith.constant 5.000000e-01 : f32
    %202 = vector.broadcast %cst_82 : f32 to vector<8x128xf32>
    %203 = arith.addf %201, %202 : vector<8x128xf32>
    %204 = vector.extract_strided_slice %195 {offsets = [0, 128], sizes = [8, 128], strides = [1, 1]} : vector<8x512xf32> to vector<8x128xf32>
    %cst_83 = arith.constant 5.000000e-01 : f32
    %205 = vector.broadcast %cst_83 : f32 to vector<8x128xf32>
    %206 = arith.mulf %205, %204 : vector<8x128xf32>
    %207 = math.tanh %206 : vector<8x128xf32>
    %cst_84 = arith.constant 5.000000e-01 : f32
    %208 = vector.broadcast %cst_84 : f32 to vector<8x128xf32>
    %209 = arith.mulf %208, %207 : vector<8x128xf32>
    %cst_85 = arith.constant 5.000000e-01 : f32
    %210 = vector.broadcast %cst_85 : f32 to vector<8x128xf32>
    %211 = arith.addf %209, %210 : vector<8x128xf32>
    %212 = vector.extract_strided_slice %195 {offsets = [0, 256], sizes = [8, 128], strides = [1, 1]} : vector<8x512xf32> to vector<8x128xf32>
    %213 = math.tanh %212 : vector<8x128xf32>
    %214 = vector.extract_strided_slice %195 {offsets = [0, 384], sizes = [8, 128], strides = [1, 1]} : vector<8x512xf32> to vector<8x128xf32>
    %cst_86 = arith.constant 5.000000e-01 : f32
    %215 = vector.broadcast %cst_86 : f32 to vector<8x128xf32>
    %216 = arith.mulf %215, %214 : vector<8x128xf32>
    %217 = math.tanh %216 : vector<8x128xf32>
    %cst_87 = arith.constant 5.000000e-01 : f32
    %218 = vector.broadcast %cst_87 : f32 to vector<8x128xf32>
    %219 = arith.mulf %218, %217 : vector<8x128xf32>
    %cst_88 = arith.constant 5.000000e-01 : f32
    %220 = vector.broadcast %cst_88 : f32 to vector<8x128xf32>
    %221 = arith.addf %219, %220 : vector<8x128xf32>
    %222 = arith.mulf %211, %189 : vector<8x128xf32>
    %223 = arith.mulf %203, %213 : vector<8x128xf32>
    %224 = arith.addf %222, %223 : vector<8x128xf32>
    %225 = math.tanh %224 : vector<8x128xf32>
    %226 = arith.mulf %221, %225 : vector<8x128xf32>
    %c48 = arith.constant 48 : index
    %c0_89 = arith.constant 0 : index
    %227 = vector.load %arg13[%c48, %c0_89] : memref<64x512xf32, #tpu.memory_space<vmem>>, vector<8x512xf32>
    %c0_90 = arith.constant 0 : index
    %c0_91 = arith.constant 0 : index
    %228 = vector.load %arg14[%c0_90, %c0_91] : memref<128x512xf32, #tpu.memory_space<vmem>>, vector<128x512xf32>
    %cst_92 = arith.constant dense<0.000000e+00> : vector<8x512xf32>
    %229 = tpu.matmul %226, %228, %cst_92 {dimension_numbers = #tpu.dot_dimension_numbers<[1], [0], [0], [1], [0, 0, 1, 1], [], []>} : vector<8x128xf32>, vector<128x512xf32>, vector<8x512xf32> -> vector<8x512xf32>
    %230 = arith.addf %227, %229 : vector<8x512xf32>
    %231 = vector.extract_strided_slice %230 {offsets = [0, 0], sizes = [8, 128], strides = [1, 1]} : vector<8x512xf32> to vector<8x128xf32>
    %cst_93 = arith.constant 5.000000e-01 : f32
    %232 = vector.broadcast %cst_93 : f32 to vector<8x128xf32>
    %233 = arith.mulf %232, %231 : vector<8x128xf32>
    %234 = math.tanh %233 : vector<8x128xf32>
    %cst_94 = arith.constant 5.000000e-01 : f32
    %235 = vector.broadcast %cst_94 : f32 to vector<8x128xf32>
    %236 = arith.mulf %235, %234 : vector<8x128xf32>
    %cst_95 = arith.constant 5.000000e-01 : f32
    %237 = vector.broadcast %cst_95 : f32 to vector<8x128xf32>
    %238 = arith.addf %236, %237 : vector<8x128xf32>
    %239 = vector.extract_strided_slice %230 {offsets = [0, 128], sizes = [8, 128], strides = [1, 1]} : vector<8x512xf32> to vector<8x128xf32>
    %cst_96 = arith.constant 5.000000e-01 : f32
    %240 = vector.broadcast %cst_96 : f32 to vector<8x128xf32>
    %241 = arith.mulf %240, %239 : vector<8x128xf32>
    %242 = math.tanh %241 : vector<8x128xf32>
    %cst_97 = arith.constant 5.000000e-01 : f32
    %243 = vector.broadcast %cst_97 : f32 to vector<8x128xf32>
    %244 = arith.mulf %243, %242 : vector<8x128xf32>
    %cst_98 = arith.constant 5.000000e-01 : f32
    %245 = vector.broadcast %cst_98 : f32 to vector<8x128xf32>
    %246 = arith.addf %244, %245 : vector<8x128xf32>
    %247 = vector.extract_strided_slice %230 {offsets = [0, 256], sizes = [8, 128], strides = [1, 1]} : vector<8x512xf32> to vector<8x128xf32>
    %248 = math.tanh %247 : vector<8x128xf32>
    %249 = vector.extract_strided_slice %230 {offsets = [0, 384], sizes = [8, 128], strides = [1, 1]} : vector<8x512xf32> to vector<8x128xf32>
    %cst_99 = arith.constant 5.000000e-01 : f32
    %250 = vector.broadcast %cst_99 : f32 to vector<8x128xf32>
    %251 = arith.mulf %250, %249 : vector<8x128xf32>
    %252 = math.tanh %251 : vector<8x128xf32>
    %cst_100 = arith.constant 5.000000e-01 : f32
    %253 = vector.broadcast %cst_100 : f32 to vector<8x128xf32>
    %254 = arith.mulf %253, %252 : vector<8x128xf32>
    %cst_101 = arith.constant 5.000000e-01 : f32
    %255 = vector.broadcast %cst_101 : f32 to vector<8x128xf32>
    %256 = arith.addf %254, %255 : vector<8x128xf32>
    %257 = arith.mulf %246, %224 : vector<8x128xf32>
    %258 = arith.mulf %238, %248 : vector<8x128xf32>
    %259 = arith.addf %257, %258 : vector<8x128xf32>
    %260 = math.tanh %259 : vector<8x128xf32>
    %261 = arith.mulf %256, %260 : vector<8x128xf32>
    %c56 = arith.constant 56 : index
    %c0_102 = arith.constant 0 : index
    %262 = vector.load %arg13[%c56, %c0_102] : memref<64x512xf32, #tpu.memory_space<vmem>>, vector<8x512xf32>
    %c0_103 = arith.constant 0 : index
    %c0_104 = arith.constant 0 : index
    %263 = vector.load %arg14[%c0_103, %c0_104] : memref<128x512xf32, #tpu.memory_space<vmem>>, vector<128x512xf32>
    %cst_105 = arith.constant dense<0.000000e+00> : vector<8x512xf32>
    %264 = tpu.matmul %261, %263, %cst_105 {dimension_numbers = #tpu.dot_dimension_numbers<[1], [0], [0], [1], [0, 0, 1, 1], [], []>} : vector<8x128xf32>, vector<128x512xf32>, vector<8x512xf32> -> vector<8x512xf32>
    %265 = arith.addf %262, %264 : vector<8x512xf32>
    %266 = vector.extract_strided_slice %265 {offsets = [0, 0], sizes = [8, 128], strides = [1, 1]} : vector<8x512xf32> to vector<8x128xf32>
    %cst_106 = arith.constant 5.000000e-01 : f32
    %267 = vector.broadcast %cst_106 : f32 to vector<8x128xf32>
    %268 = arith.mulf %267, %266 : vector<8x128xf32>
    %269 = math.tanh %268 : vector<8x128xf32>
    %cst_107 = arith.constant 5.000000e-01 : f32
    %270 = vector.broadcast %cst_107 : f32 to vector<8x128xf32>
    %271 = arith.mulf %270, %269 : vector<8x128xf32>
    %cst_108 = arith.constant 5.000000e-01 : f32
    %272 = vector.broadcast %cst_108 : f32 to vector<8x128xf32>
    %273 = arith.addf %271, %272 : vector<8x128xf32>
    %274 = vector.extract_strided_slice %265 {offsets = [0, 128], sizes = [8, 128], strides = [1, 1]} : vector<8x512xf32> to vector<8x128xf32>
    %cst_109 = arith.constant 5.000000e-01 : f32
    %275 = vector.broadcast %cst_109 : f32 to vector<8x128xf32>
    %276 = arith.mulf %275, %274 : vector<8x128xf32>
    %277 = math.tanh %276 : vector<8x128xf32>
    %cst_110 = arith.constant 5.000000e-01 : f32
    %278 = vector.broadcast %cst_110 : f32 to vector<8x128xf32>
    %279 = arith.mulf %278, %277 : vector<8x128xf32>
    %cst_111 = arith.constant 5.000000e-01 : f32
    %280 = vector.broadcast %cst_111 : f32 to vector<8x128xf32>
    %281 = arith.addf %279, %280 : vector<8x128xf32>
    %282 = vector.extract_strided_slice %265 {offsets = [0, 256], sizes = [8, 128], strides = [1, 1]} : vector<8x512xf32> to vector<8x128xf32>
    %283 = math.tanh %282 : vector<8x128xf32>
    %284 = vector.extract_strided_slice %265 {offsets = [0, 384], sizes = [8, 128], strides = [1, 1]} : vector<8x512xf32> to vector<8x128xf32>
    %cst_112 = arith.constant 5.000000e-01 : f32
    %285 = vector.broadcast %cst_112 : f32 to vector<8x128xf32>
    %286 = arith.mulf %285, %284 : vector<8x128xf32>
    %287 = math.tanh %286 : vector<8x128xf32>
    %cst_113 = arith.constant 5.000000e-01 : f32
    %288 = vector.broadcast %cst_113 : f32 to vector<8x128xf32>
    %289 = arith.mulf %288, %287 : vector<8x128xf32>
    %cst_114 = arith.constant 5.000000e-01 : f32
    %290 = vector.broadcast %cst_114 : f32 to vector<8x128xf32>
    %291 = arith.addf %289, %290 : vector<8x128xf32>
    %292 = arith.mulf %281, %259 : vector<8x128xf32>
    %293 = arith.mulf %273, %283 : vector<8x128xf32>
    %294 = arith.addf %292, %293 : vector<8x128xf32>
    %295 = math.tanh %294 : vector<8x128xf32>
    %296 = arith.mulf %291, %295 : vector<8x128xf32>
    %297 = tpu.iota {dimensions = array<i32: 1>} : vector<32x8xi32>
    %c0_115 = arith.constant 0 : index
    %c0_116 = arith.constant 0 : index
    %298 = vector.load %arg4[%c0_115, %c0_116] : memref<32x1xi32, #tpu.memory_space<vmem>>, vector<32x1xi32>
    %299 = vector.broadcast %298 : vector<32x1xi32> to vector<32x8xi32>
    %300 = arith.cmpi eq, %297, %299 : vector<32x8xi32>
    %cst_117 = arith.constant 1.000000e+00 : f32
    %cst_118 = arith.constant 0.000000e+00 : f32
    %301 = vector.broadcast %cst_117 : f32 to vector<32x8xf32>
    %302 = vector.broadcast %cst_118 : f32 to vector<32x8xf32>
    %303 = arith.select %300, %301, %302 : vector<32x8xi1>, vector<32x8xf32>
    %cst_119 = arith.constant dense<0.000000e+00> : vector<32x128xf32>
    %304 = tpu.matmul %303, %296, %cst_119 {dimension_numbers = #tpu.dot_dimension_numbers<[1], [0], [0], [1], [0, 0, 1, 1], [], []>} : vector<32x8xf32>, vector<8x128xf32>, vector<32x128xf32> -> vector<32x128xf32>
    %305 = vector.extract_strided_slice %304 {offsets = [0, 0], sizes = [16, 128], strides = [1, 1]} : vector<32x128xf32> to vector<16x128xf32>
    %306 = vector.extract_strided_slice %304 {offsets = [16, 0], sizes = [16, 128], strides = [1, 1]} : vector<32x128xf32> to vector<16x128xf32>
    %c1_i32_120 = arith.constant 1 : i32
    %307 = tpu.memref_slice %arg17[%c1_i32_120] : memref<3x!tpu.dma_semaphore, #tpu.memory_space<semaphore_mem>> -> memref<1x!tpu.dma_semaphore, #tpu.memory_space<semaphore_mem>>
    %308 = tpu.memref_squeeze %307 : memref<1x!tpu.dma_semaphore, #tpu.memory_space<semaphore_mem>> -> memref<!tpu.dma_semaphore, #tpu.memory_space<semaphore_mem>>
    tpu.wait_dma2 semaphore(%308 : memref<!tpu.dma_semaphore, #tpu.memory_space<semaphore_mem>>) src(%arg5 : memref<128x128xf32, #tpu.memory_space<any>>) dst(%arg15 : memref<128x128xf32, #tpu.memory_space<vmem>>)
    %c2_i32_121 = arith.constant 2 : i32
    %309 = tpu.memref_slice %arg17[%c2_i32_121] : memref<3x!tpu.dma_semaphore, #tpu.memory_space<semaphore_mem>> -> memref<1x!tpu.dma_semaphore, #tpu.memory_space<semaphore_mem>>
    %310 = tpu.memref_squeeze %309 : memref<1x!tpu.dma_semaphore, #tpu.memory_space<semaphore_mem>> -> memref<!tpu.dma_semaphore, #tpu.memory_space<semaphore_mem>>
    tpu.wait_dma2 semaphore(%310 : memref<!tpu.dma_semaphore, #tpu.memory_space<semaphore_mem>>) src(%arg6 : memref<128x128xf32, #tpu.memory_space<any>>) dst(%arg16 : memref<128x128xf32, #tpu.memory_space<vmem>>)
    %c0_122 = arith.constant 0 : index
    %c0_123 = arith.constant 0 : index
    %311 = vector.load %arg15[%c0_122, %c0_123] : memref<128x128xf32, #tpu.memory_space<vmem>>, vector<128x128xf32>
    %cst_124 = arith.constant dense<0.000000e+00> : vector<16x128xf32>
    %312 = tpu.matmul %305, %311, %cst_124 {dimension_numbers = #tpu.dot_dimension_numbers<[1], [0], [0], [1], [0, 0, 1, 1], [], []>} : vector<16x128xf32>, vector<128x128xf32>, vector<16x128xf32> -> vector<16x128xf32>
    %c0_125 = arith.constant 0 : index
    %c0_126 = arith.constant 0 : index
    %313 = vector.load %arg16[%c0_125, %c0_126] : memref<128x128xf32, #tpu.memory_space<vmem>>, vector<128x128xf32>
    %cst_127 = arith.constant dense<0.000000e+00> : vector<16x128xf32>
    %314 = tpu.matmul %306, %313, %cst_127 {dimension_numbers = #tpu.dot_dimension_numbers<[1], [0], [0], [1], [0, 0, 1, 1], [], []>} : vector<16x128xf32>, vector<128x128xf32>, vector<16x128xf32> -> vector<16x128xf32>
    %315 = arith.addf %312, %314 : vector<16x128xf32>
    %c0_128 = arith.constant 0 : index
    %c0_129 = arith.constant 0 : index
    %316 = vector.load %arg7[%c0_128, %c0_129] : memref<1x128xf32, #tpu.memory_space<vmem>>, vector<1x128xf32>
    %317 = vector.broadcast %316 : vector<1x128xf32> to vector<16x128xf32>
    %318 = arith.addf %315, %317 : vector<16x128xf32>
    %cst_130 = arith.constant 0.000000e+00 : f32
    %319 = vector.broadcast %cst_130 : f32 to vector<16x128xf32>
    %320 = arith.maximumf %318, %319 : vector<16x128xf32>
    %c0_131 = arith.constant 0 : index
    %c0_132 = arith.constant 0 : index
    %321 = vector.load %arg8[%c0_131, %c0_132] : memref<128x32xf32, #tpu.memory_space<vmem>>, vector<128x32xf32>
    %cst_133 = arith.constant dense<0.000000e+00> : vector<16x32xf32>
    %322 = tpu.matmul %320, %321, %cst_133 {dimension_numbers = #tpu.dot_dimension_numbers<[1], [0], [0], [1], [0, 0, 1, 1], [], []>} : vector<16x128xf32>, vector<128x32xf32>, vector<16x32xf32> -> vector<16x32xf32>
    %c0_134 = arith.constant 0 : index
    %c0_135 = arith.constant 0 : index
    %323 = vector.load %arg9[%c0_134, %c0_135] : memref<1x32xf32, #tpu.memory_space<vmem>>, vector<1x32xf32>
    %324 = vector.broadcast %323 : vector<1x32xf32> to vector<16x32xf32>
    %325 = arith.addf %322, %324 : vector<16x32xf32>
    %cst_136 = arith.constant 0.000000e+00 : f32
    %326 = vector.broadcast %cst_136 : f32 to vector<16x32xf32>
    %327 = arith.maximumf %325, %326 : vector<16x32xf32>
    %c0_137 = arith.constant 0 : index
    %c0_138 = arith.constant 0 : index
    %328 = vector.load %arg10[%c0_137, %c0_138] : memref<1x32xf32, #tpu.memory_space<vmem>>, vector<1x32xf32>
    %329 = vector.broadcast %328 : vector<1x32xf32> to vector<16x32xf32>
    %330 = arith.mulf %327, %329 : vector<16x32xf32>
    %cst_139 = arith.constant dense<0.000000e+00> : vector<16xf32>
    %331 = vector.multi_reduction <add>, %330, %cst_139 [1] : vector<16x32xf32> to vector<16xf32>
    %332 = vector.shape_cast %331 : vector<16xf32> to vector<16x1xf32>
    %c0_140 = arith.constant 0 : index
    %c0_141 = arith.constant 0 : index
    %333 = vector.load %arg11[%c0_140, %c0_141] : memref<1x1xf32, #tpu.memory_space<vmem>>, vector<1x1xf32>
    %334 = vector.broadcast %333 : vector<1x1xf32> to vector<16x1xf32>
    %335 = arith.addf %332, %334 : vector<16x1xf32>
    %cst_142 = arith.constant 5.000000e-01 : f32
    %336 = vector.broadcast %cst_142 : f32 to vector<16x1xf32>
    %337 = arith.mulf %336, %335 : vector<16x1xf32>
    %338 = math.tanh %337 : vector<16x1xf32>
    %cst_143 = arith.constant 5.000000e-01 : f32
    %339 = vector.broadcast %cst_143 : f32 to vector<16x1xf32>
    %340 = arith.mulf %339, %338 : vector<16x1xf32>
    %cst_144 = arith.constant 5.000000e-01 : f32
    %341 = vector.broadcast %cst_144 : f32 to vector<16x1xf32>
    %342 = arith.addf %340, %341 : vector<16x1xf32>
    %c0_145 = arith.constant 0 : index
    %c0_146 = arith.constant 0 : index
    %343 = vector.load %arg12[%c0_145, %c0_146] : memref<16x1xf32, #tpu.memory_space<vmem>>, vector<16x1xf32>
    tpu.vector_store %arg12[%c0_145, %c0_146], %342 {strides = array<i32>} : memref<16x1xf32, #tpu.memory_space<vmem>>, vector<16x1xf32>,
    return
  }
}

</mosaic_0001>

<bundles_post_ra>
// kernel: lstm_sc_pass_forward.1
= control target key start
LH: loop header
LB: loop body
LE: loop exit
PB: predicated region body
PF: predicated region fallthrough
CT: control target
= control target key end

     0   :  { %s4361_s0 = inlined_call_operand.vmem [shape: f32[64,3], index: 0, kind: input, shape index: {}]   ;;  %s4362_s1 = inlined_call_operand.hbm [shape: f32[3,512], index: 1, kind: input, shape index: {}]   ;;  %s4363_s2 = inlined_call_operand.hbm [shape: f32[1,512], index: 2, kind: input, shape index: {}]   ;;  %s4364_s3 = inlined_call_operand.hbm [shape: f32[128,512], index: 3, kind: input, shape index: {}]   ;;  %s4365_s4 = inlined_call_operand.vmem [shape: s32[32,1], index: 4, kind: input, shape index: {}]   ;;  %s4366_s5 = inlined_call_operand.vmem [shape: f32[128,128], index: 5, kind: input, shape index: {}]   ;;  %s4367_s6 = inlined_call_operand.vmem [shape: f32[128,128], index: 6, kind: input, shape index: {}]   ;;  %s4368_s7 = inlined_call_operand.vmem [shape: f32[1,128], index: 7, kind: input, shape index: {}]   ;;  %s4369_s8 = inlined_call_operand.vmem [shape: f32[128,32], index: 8, kind: input, shape index: {}]   ;;  %s4370_s9 = inlined_call_operand.vmem [shape: f32[1,32], index: 9, kind: input, shape index: {}]   ;;  %s4371_s10 = inlined_call_operand.vmem [shape: f32[1,32], index: 10, kind: input, shape index: {}]   ;;  %s4372_s11 = inlined_call_operand.<no memory space> [shape: f32[1,1], index: 11, kind: input, shape index: {}]   ;;  %s4373_s12 = inlined_call_operand.vmem [shape: f32[16,1], index: 12, kind: output, shape index: {}]  }
   0x1   :  { %v17_v0 = vstv %s4372_s11 }
   0x2   :  { %18 = vst [vmem:[#allocation7] sm:$0x1] %v17_v0 }
   0x3   :  { %19 = vsyncpa [#allocation9], 0 }
   0x4   :  { %20 = vsyncpa [#allocation11], 0  ;;  %s3504_s23 = smov [#allocation8]   ;;  %s3505_s25 = smov [#allocation10]  }
   0x5   :  { %s29_s24 = sshll.u32 %s3504_s23, 4  ;;  %s39_s26 = sshll.u32 %s3505_s25, 4  ;;  %s30_s24 = int_to_ptr.vmem [resolvable:$true] %s29_s24  ;;  %s40_s26 = int_to_ptr.vmem [resolvable:$true] %s39_s26 }
   0x6   :  { %s3428_s29 = scalar_lea.hbm %s4362_s1, 256 }
   0x7   :  { %p3429_p0 = scmp.ne.s32.totalorder %s4362_s1, %s3428_s29  ;;  %p3432_p1 = scmp.lt.u32.totalorder %s3428_s29, %s4362_s1 }
   0x9   :  { %p3434_p2 = pnand %p3432_p1, %p3429_p0 }
   0xb   :  { %3437 = shalt.err (!%p3434_p2)
}
   0xc   :  { %s3438_s11 = scalar_lea.vmem %s30_s24, 256  ;;  %p3443_p4 = scmp.lt.s32.totalorder %s30_s24, %s30_s24 }
   0xd   :  { %p3439_p3 = scmp.ne.s32.totalorder %s30_s24, %s3438_s11  ;;  %p3444_p5 = scmp.lt.s32.totalorder %s3438_s11, %s3438_s11 }
   0xf   :  { %p3445_p6 = por %p3444_p5, %p3443_p4 }
  0x11   :  { %p3446_p7 = pnand %p3445_p6, %p3439_p3 }
  0x13   :  { %3449 = shalt.err (!%p3446_p7)
}
  0x14   :  { %32 = dma.hbm_to_vmem [thread:$0]  %s4362_s1, 256, %s30_s24, [#allocation9]  }
  0x15   :  { %s3450_s20 = scalar_lea.hbm %s4363_s2, 64 }
  0x16   :  { %p3451_p8 = scmp.ne.s32.totalorder %s4363_s2, %s3450_s20  ;;  %p3454_p9 = scmp.lt.u32.totalorder %s3450_s20, %s4363_s2 }
  0x18   :  { %p3456_p10 = pnand %p3454_p9, %p3451_p8 }
  0x1a   :  { %3459 = shalt.err (!%p3456_p10)
}
  0x1b   :  { %s3460_s27 = scalar_lea.vmem %s40_s26, 64  ;;  %p3465_p12 = scmp.lt.s32.totalorder %s40_s26, %s40_s26 }
  0x1c   :  { %p3461_p11 = scmp.ne.s32.totalorder %s40_s26, %s3460_s27  ;;  %p3466_p13 = scmp.lt.s32.totalorder %s3460_s27, %s3460_s27 }
  0x1e   :  { %p3467_p0 = por %p3466_p13, %p3465_p12 }
  0x20   :  { %p3468_p1 = pnand %p3467_p0, %p3461_p11 }
  0x22   :  { %3471 = shalt.err (!%p3468_p1)
}
  0x23   :  { %42 = dma.hbm_to_vmem [thread:$0]  %s4363_s2, 64, %s40_s26, [#allocation11]  }
  0x24   :  { %3494 = dma.done.wait [#allocation9], 256  }
  0x25   :  { %3495 = vsyncadd [#allocation9], 4294967040 }
  0x26   :  { %3496 = dma.done.wait [#allocation11], 64  }
  0x27   :  { %3497 = vsyncadd [#allocation11], 4294967232  ;;  %s3506_s28 = smov [#allocation3]   ;;  %s3472_s14 = scalar_lea.hbm %s4364_s3, 8192 }
  0x28   :  { %s68_s29 = sshll.u32 %s3506_s28, 4  ;;  %p3473_p2 = scmp.ne.s32.totalorder %s4364_s3, %s3472_s14  ;;  %s69_s29 = int_to_ptr.vmem [resolvable:$true] %s68_s29 }
  0x29   :  { %p3476_p3 = scmp.lt.u32.totalorder %s3472_s14, %s4364_s3 }
  0x2b   :  { %p3478_p4 = pnand %p3476_p3, %p3473_p2 }
  0x2d   :  { %3481 = shalt.err (!%p3478_p4)  }
  0x2e   :  { %s3482_s2 = scalar_lea.vmem %s69_s29, 8192  ;;  %p3487_p6 = scmp.lt.s32.totalorder %s69_s29, %s69_s29 }
  0x2f   :  { %p3483_p5 = scmp.ne.s32.totalorder %s69_s29, %s3482_s2  ;;  %p3488_p7 = scmp.lt.s32.totalorder %s3482_s2, %s3482_s2 }
  0x31   :  { %p3489_p8 = por %p3488_p7, %p3487_p6 }
  0x33   :  { %p3490_p9 = pnand %p3489_p8, %p3483_p5 }
  0x35   :  { %3493 = shalt.err (!%p3490_p9)  }
  0x36   :  { %71 = dma.hbm_to_vmem [thread:$0]  %s4364_s3, 8192, %s69_s29, [#allocation6]  ;;  %v3616_v1 = vld [vmem:[%s4366_s5] sm:$0xff]  ;;  %v3621_v2 = vld [vmem:[%s4366_s5 + $0x8] sm:$0xff]  ;;  %v3626_v3 = vld [vmem:[%s4366_s5 + $0x10] sm:$0xff] }
  0x37   :  { %4377 = vst [vmem:[#allocation23_spill] sm:$0xff] %v3616_v1  ;;  %4378 = vst [vmem:[#allocation24_spill] sm:$0xff] %v3621_v2  ;;  %v3631_v4 = vld [vmem:[%s4366_s5 + $0x18] sm:$0xff]  ;;  %v3636_v5 = vld [vmem:[%s4366_s5 + $0x20] sm:$0xff] }
  0x38   :  { %4379 = vst [vmem:[#allocation25_spill] sm:$0xff] %v3626_v3  ;;  %4380 = vst [vmem:[#allocation26_spill] sm:$0xff] %v3631_v4  ;;  %v3641_v6 = vld [vmem:[%s4366_s5 + $0x28] sm:$0xff]  ;;  %v3646_v7 = vld [vmem:[%s4366_s5 + $0x30] sm:$0xff] }
  0x39   :  { %4381 = vst [vmem:[#allocation27_spill] sm:$0xff] %v3636_v5  ;;  %4382 = vst [vmem:[#allocation28_spill] sm:$0xff] %v3641_v6  ;;  %v3651_v8 = vld [vmem:[%s4366_s5 + $0x38] sm:$0xff]  ;;  %v3656_v9 = vld [vmem:[%s4366_s5 + $0x40] sm:$0xff] }
  0x3a   :  { %4383 = vst [vmem:[#allocation29_spill] sm:$0xff] %v3646_v7  ;;  %4384 = vst [vmem:[#allocation30_spill] sm:$0xff] %v3651_v8  ;;  %v3661_v10 = vld [vmem:[%s4366_s5 + $0x48] sm:$0xff]  ;;  %v3666_v11 = vld [vmem:[%s4366_s5 + $0x50] sm:$0xff] }
  0x3b   :  { %4385 = vst [vmem:[#allocation31_spill] sm:$0xff] %v3656_v9  ;;  %4386 = vst [vmem:[#allocation32_spill] sm:$0xff] %v3661_v10  ;;  %v3671_v12 = vld [vmem:[%s4366_s5 + $0x58] sm:$0xff]  ;;  %v3676_v13 = vld [vmem:[%s4366_s5 + $0x60] sm:$0xff] }
  0x3c   :  { %4387 = vst [vmem:[#allocation33_spill] sm:$0xff] %v3666_v11  ;;  %4388 = vst [vmem:[#allocation34_spill] sm:$0xff] %v3671_v12  ;;  %v3681_v14 = vld [vmem:[%s4366_s5 + $0x68] sm:$0xff]  ;;  %v3686_v15 = vld [vmem:[%s4366_s5 + $0x70] sm:$0xff] }
  0x3d   :  { %4389 = vst [vmem:[#allocation35_spill] sm:$0xff] %v3676_v13  ;;  %4390 = vst [vmem:[#allocation36_spill] sm:$0xff] %v3681_v14  ;;  %v3691_v16 = vld [vmem:[%s4366_s5 + $0x78] sm:$0xff] }
  0x3e   :  { %4391 = vst [vmem:[#allocation37_spill] sm:$0xff] %v3686_v15  ;;  %4392 = vst [vmem:[#allocation38_spill] sm:$0xff] %v3691_v16 }
  0x3f   :  { %144 = vsyncadd [#allocation6 + $0x1], 2048  ;;  %v3696_v17 = vld [vmem:[%s4367_s6] sm:$0xff]  ;;  %v3701_v18 = vld [vmem:[%s4367_s6 + $0x8] sm:$0xff] }
  0x40   :  { %v3706_v19 = vld [vmem:[%s4367_s6 + $0x10] sm:$0xff]  ;;  %v3711_v20 = vld [vmem:[%s4367_s6 + $0x18] sm:$0xff]  ;;  %v3716_v21 = vld [vmem:[%s4367_s6 + $0x20] sm:$0xff] }
  0x41   :  { %v3721_v22 = vld [vmem:[%s4367_s6 + $0x28] sm:$0xff]  ;;  %v3726_v23 = vld [vmem:[%s4367_s6 + $0x30] sm:$0xff]  ;;  %v3731_v24 = vld [vmem:[%s4367_s6 + $0x38] sm:$0xff] }
  0x42   :  { %v3736_v25 = vld [vmem:[%s4367_s6 + $0x40] sm:$0xff]  ;;  %v3741_v26 = vld [vmem:[%s4367_s6 + $0x48] sm:$0xff]  ;;  %v3746_v27 = vld [vmem:[%s4367_s6 + $0x50] sm:$0xff] }
  0x43   :  { %4393 = vst [vmem:[#allocation39_spill] sm:$0xff] %v3736_v25  ;;  %4394 = vst [vmem:[#allocation40_spill] sm:$0xff] %v3741_v26  ;;  %v3751_v28 = vld [vmem:[%s4367_s6 + $0x58] sm:$0xff]  ;;  %v3756_v29 = vld [vmem:[%s4367_s6 + $0x60] sm:$0xff] }
  0x44   :  { %4395 = vst [vmem:[#allocation41_spill] sm:$0xff] %v3746_v27  ;;  %4396 = vst [vmem:[#allocation42_spill] sm:$0xff] %v3751_v28  ;;  %v3761_v30 = vld [vmem:[%s4367_s6 + $0x68] sm:$0xff]  ;;  %v3766_v31 = vld [vmem:[%s4367_s6 + $0x70] sm:$0xff] }
  0x45   :  { %4397 = vst [vmem:[#allocation43_spill] sm:$0xff] %v3756_v29  ;;  %4398 = vst [vmem:[#allocation44_spill] sm:$0xff] %v3761_v30  ;;  %v3771_v32 = vld [vmem:[%s4367_s6 + $0x78] sm:$0xff] }
  0x46   :  { %4399 = vst [vmem:[#allocation45_spill] sm:$0xff] %v3766_v31  ;;  %4400 = vst [vmem:[#allocation46_spill] sm:$0xff] %v3771_v32 }
  0x47   :  { %217 = vsyncadd [#allocation6 + $0x2], 2048  ;;  %v226_v33 = vld [vmem:[#allocation8] sm:$0x77]  ;;  %v4374_v34 = vlaneseq  ;;  %vm279_vm0 = vcmask 1042432   ;;  %v4375_v39 = vmov 0.0  }
  0x48   :  { %v252_v35 = vcombine.high %v226_v33, %v226_v33  ;;  %v227_v36 = vld [vmem:[#allocation8 + $0x8] sm:$0x77]  ;;  %352 = vmatprep.mubr.f32.mxu0 %v4375_v39  ;;  %465 = vmatprep.mubr.f32.mxu1 %v4375_v39  ;;  %v218_v40 = vld [vmem:[%s4361_s0] sm:$0xff]  ;;  %vm254_vm1 = vcmask 23552   ;;  %v228_v41 = vld [vmem:[#allocation10] sm:$0xf] }
  0x49   :  { %v231_v37 = vshrl.u32 %v4374_v34, 7  ;;  %v253_v38 = vcombine.high %v227_v36, %v227_v36  ;;  %v219_v50 = vld [vmem:[%s4361_s0 + $0x8] sm:$0xff]  ;;  %v220_v51 = vld [vmem:[%s4361_s0 + $0x10] sm:$0xff]  ;;  %v221_v52 = vld [vmem:[%s4361_s0 + $0x18] sm:$0xff] }
  0x4a   :  { %2458 = vmatprep.subr.msk.mxu0 %vm279_vm0, %v252_v35  ;;  %v222_v53 = vld [vmem:[%s4361_s0 + $0x20] sm:$0xff]  ;;  %v223_v54 = vld [vmem:[%s4361_s0 + $0x28] sm:$0xff]  ;;  %v224_v55 = vld [vmem:[%s4361_s0 + $0x30] sm:$0xff] }
  0x4b   :  { %v232_v42 = vsub.s32 0, %v231_v37  ;;  %v236_v43 = vsub.s32 1, %v231_v37  ;;  %v240_v44 = vsub.s32 2, %v231_v37  ;;  %v244_v45 = vsub.s32 3, %v231_v37  ;;  %2468 = vmatprep.subr.msk.mxu1 %vm279_vm0, %v253_v38  ;;  %2459 = vmatpush1.msk.msra.mxu0 %vm279_vm0, %v226_v33  ;;  %v225_v56 = vld [vmem:[%s4361_s0 + $0x38] sm:$0xff] }
  0x4c   :  { %2469 = vmatpush1.msk.msra.mxu1 %vm279_vm0, %v227_v36  ;;  %2460 = vmatmul.mubr.msk.f32.vlgmr.msra.gmra.mrb[0].mxu0 %vm254_vm1, %v218_v40 }
  0x4d   :  { %v3784_v46 = vrot.slane %v228_v41, %v232_v42  ;;  %v3786_v47 = vrot.slane %v228_v41, %v236_v43  ;;  %v3788_v48 = vrot.slane %v228_v41, %v240_v44  ;;  %v3790_v49 = vrot.slane %v228_v41, %v244_v45  ;;  %2470 = vmatmul.mubr.msk.f32.vlgmr.msra.gmra.mrb[0].mxu1 %vm254_vm1, %v218_v40 }
  0x4e   :  { %358 = vmatprep.mubr.f32.mxu0 %v4375_v39  ;;  %471 = vmatprep.mubr.f32.mxu1 %v4375_v39 }
  0x50   :  { %2461 = vmatmul.mubr.msk.f32.gmra.mrb[2].mxu0 %vm254_vm1, %v219_v50 }
  0x51   :  { %2471 = vmatmul.mubr.msk.f32.gmra.mrb[2].mxu1 %vm254_vm1, %v219_v50  ;;  %364 = vmatprep.mubr.f32.mxu0 %v4375_v39 }
  0x52   :  { %477 = vmatprep.mubr.f32.mxu1 %v4375_v39 }
  0x54   :  { %2462 = vmatmul.mubr.msk.f32.gmra.mrb[4].mxu0 %vm254_vm1, %v220_v51 }
  0x55   :  { %2472 = vmatmul.mubr.msk.f32.gmra.mrb[4].mxu1 %vm254_vm1, %v220_v51  ;;  %370 = vmatprep.mubr.f32.mxu0 %v4375_v39 }
  0x56   :  { %483 = vmatprep.mubr.f32.mxu1 %v4375_v39 }
  0x58   :  { %2463 = vmatmul.mubr.msk.f32.gmra.mrb[6].mxu0 %vm254_vm1, %v221_v52 }
  0x59   :  { %2473 = vmatmul.mubr.msk.f32.gmra.mrb[6].mxu1 %vm254_vm1, %v221_v52  ;;  %376 = vmatprep.mubr.f32.mxu0 %v4375_v39 }
  0x5a   :  { %489 = vmatprep.mubr.f32.mxu1 %v4375_v39 }
  0x5c   :  { %2464 = vmatmul.mubr.msk.f32.gmra.mrb[8].mxu0 %vm254_vm1, %v222_v53 }
  0x5d   :  { %2474 = vmatmul.mubr.msk.f32.gmra.mrb[8].mxu1 %vm254_vm1, %v222_v53  ;;  %382 = vmatprep.mubr.f32.mxu0 %v4375_v39 }
  0x5e   :  { %495 = vmatprep.mubr.f32.mxu1 %v4375_v39 }
  0x60   :  { %2465 = vmatmul.mubr.msk.f32.gmra.mrb[10].mxu0 %vm254_vm1, %v223_v54 }
  0x61   :  { %2475 = vmatmul.mubr.msk.f32.gmra.mrb[10].mxu1 %vm254_vm1, %v223_v54  ;;  %388 = vmatprep.mubr.f32.mxu0 %v4375_v39 }
  0x62   :  { %501 = vmatprep.mubr.f32.mxu1 %v4375_v39 }
  0x64   :  { %2466 = vmatmul.mubr.msk.f32.gmra.mrb[12].mxu0 %vm254_vm1, %v224_v55 }
  0x65   :  { %2476 = vmatmul.mubr.msk.f32.gmra.mrb[12].mxu1 %vm254_vm1, %v224_v55  ;;  %394 = vmatprep.mubr.f32.mxu0 %v4375_v39 }
  0x66   :  { %507 = vmatprep.mubr.f32.mxu1 %v4375_v39 }
  0x68   :  { %2467 = vmatmul.mubr.msk.f32.gmra.mrb[14].mxu0 %vm254_vm1, %v225_v56 }
  0x69   :  { %2477 = vmatmul.mubr.msk.f32.gmra.mrb[14].mxu1 %vm254_vm1, %v225_v56 }
  0x6a   :  { %3498 = dma.done.wait [#allocation6], 8192 }
  0x6b   :  { %3499 = vsyncadd [#allocation6], 4294959104  ;;  %682 = vmatprep.mubr.f32.mxu0 %v4375_v39  ;;  %753 = vmatprep.mubr.f32.mxu1 %v4375_v39  ;;  %v555_v57 = vld [vmem:[#allocation3 + $0x8] sm:$0xff]  ;;  %v554_v59 = vld [vmem:[#allocation3] sm:$0xff]  ;;  %vm1984_vm3 = vcmask 64512  }
  0x6c   :  { %v559_v58 = vld [vmem:[#allocation3 + $0x28] sm:$0xff]  ;;  %v558_v61 = vld [vmem:[#allocation3 + $0x20] sm:$0xff]  ;;  %v557_v37 = vld [vmem:[#allocation3 + $0x18] sm:$0xff] }
  0x6d   :  { %v3844_v60 = vpack.c.bf16 %v559_v58, %v555_v57  ;;  %v563_v62 = vld [vmem:[#allocation3 + $0x48] sm:$0xff]  ;;  %v3846_v0 = vpack.c.bf16 %v558_v61, %v554_v59  ;;  %v562_v35 = vld [vmem:[#allocation3 + $0x40] sm:$0xff]  ;;  %v561_v38 = vld [vmem:[#allocation3 + $0x38] sm:$0xff] }
  0x6e   :  { %v567_v63 = vld [vmem:[#allocation3 + $0x68] sm:$0xff]  ;;  %v566_v36 = vld [vmem:[#allocation3 + $0x60] sm:$0xff]  ;;  %v556_v40 = vld [vmem:[#allocation3 + $0x10] sm:$0xff]  ;;  %v3854_v43 = vpack.c.bf16 %v561_v38, %v557_v37 }
  0x6f   :  { %v3848_v33 = vpack.c.bf16 %v567_v63, %v563_v62  ;;  %2662 = vmatprep.subr.bf16.mxu0 %v3844_v60  ;;  %v560_v41 = vld [vmem:[#allocation3 + $0x30] sm:$0xff]  ;;  %v3852_v42 = vpack.c.bf16 %v566_v36, %v562_v35  ;;  %v571_v45 = vld [vmem:[#allocation3 + $0x88] sm:$0xff]  ;;  %v570_v51 = vld [vmem:[#allocation3 + $0x80] sm:$0xff] }
  0x70   :  { %2664 = vmatpush1.bf16.msra.mxu0 %v3846_v0  ;;  %v3856_v44 = vpack.c.bf16 %v560_v41, %v556_v40  ;;  %v575_v50 = vld [vmem:[#allocation3 + $0xa8] sm:$0xff]  ;;  %v574_v53 = vld [vmem:[#allocation3 + $0xa0] sm:$0xff]  ;;  %v565_v54 = vld [vmem:[#allocation3 + $0x58] sm:$0xff]  ;;  %2694 = vmatprep.subr.bf16.mxu1 %v3854_v43 }
  0x71   :  { %2666 = vmatprep.subr.bf16.mxu0 %v3848_v33  ;;  %v3859_v52 = vpack.c.bf16 %v575_v50, %v571_v45  ;;  %v569_v55 = vld [vmem:[#allocation3 + $0x78] sm:$0xff]  ;;  %v564_v57 = vld [vmem:[#allocation3 + $0x50] sm:$0xff]  ;;  %v579_v59 = vld [vmem:[#allocation3 + $0xc8] sm:$0xff]  ;;  %v3868_v63 = vpack.c.bf16 %v574_v53, %v570_v51 }
  0x72   :  { %v3862_v56 = vpack.c.bf16 %v569_v55, %v565_v54  ;;  %v568_v58 = vld [vmem:[#allocation3 + $0x70] sm:$0xff]  ;;  %2696 = vmatpush1.bf16.msra.mxu1 %v3856_v44  ;;  %v583_v62 = vld [vmem:[#allocation3 + $0xe8] sm:$0xff]  ;;  %v573_v35 = vld [vmem:[#allocation3 + $0x98] sm:$0xff] }
  0x73   :  { %v3865_v61 = vpack.c.bf16 %v568_v58, %v564_v57  ;;  %v577_v36 = vld [vmem:[#allocation3 + $0xb8] sm:$0xff]  ;;  %v572_v37 = vld [vmem:[#allocation3 + $0x90] sm:$0xff]  ;;  %v3872_v38 = vpack.c.bf16 %v583_v62, %v579_v59  ;;  %v578_v40 = vld [vmem:[#allocation3 + $0xc0] sm:$0xff] }
  0x74   :  { %2668 = vmatpush1.bf16.msra.mxu0 %v3852_v42  ;;  %2698 = vmatprep.subr.bf16.mxu1 %v3862_v56  ;;  %v582_v41 = vld [vmem:[#allocation3 + $0xe0] sm:$0xff]  ;;  %v3874_v45 = vpack.c.bf16 %v577_v36, %v573_v35  ;;  %v576_v50 = vld [vmem:[#allocation3 + $0xb0] sm:$0xff]  ;;  %v587_v54 = vld [vmem:[#allocation3 + $0x108] sm:$0xff] }
  0x75   :  { %2670 = vmatprep.subr.bf16.mxu0 %v3859_v52  ;;  %v591_v55 = vld [vmem:[#allocation3 + $0x128] sm:$0xff]  ;;  %v581_v57 = vld [vmem:[#allocation3 + $0xd8] sm:$0xff]  ;;  %v3877_v51 = vpack.c.bf16 %v576_v50, %v572_v37  ;;  %v3880_v58 = vpack.c.bf16 %v582_v41, %v578_v40  ;;  %v586_v59 = vld [vmem:[#allocation3 + $0x100] sm:$0xff] }
  0x76   :  { %2700 = vmatpush1.bf16.msra.mxu1 %v3865_v61  ;;  %v585_v53 = vld [vmem:[#allocation3 + $0xf8] sm:$0xff]  ;;  %v580_v35 = vld [vmem:[#allocation3 + $0xd0] sm:$0xff]  ;;  %v3886_v34 = vpack.c.bf16 %v591_v55, %v587_v54  ;;  %v590_v39 = vld [vmem:[#allocation3 + $0x120] sm:$0xff] }
  0x77   :  { %2702 = vmatprep.subr.bf16.mxu1 %v3874_v45  ;;  %v3883_v62 = vpack.c.bf16 %v585_v53, %v581_v57  ;;  %v584_v36 = vld [vmem:[#allocation3 + $0xf0] sm:$0xff]  ;;  %v589_v16 = vld [vmem:[#allocation3 + $0x118] sm:$0xff]  ;;  %v595_v50 = vld [vmem:[#allocation3 + $0x148] sm:$0xff]  ;;  %v3892_v41 = vpack.c.bf16 %v590_v39, %v586_v59 }
  0x78   :  { %2672 = vmatpush1.bf16.msra.mxu0 %v3868_v63  ;;  %v593_v37 = vld [vmem:[#allocation3 + $0x138] sm:$0xff]  ;;  %v599_v15 = vld [vmem:[#allocation3 + $0x168] sm:$0xff]  ;;  %v3889_v40 = vpack.c.bf16 %v584_v36, %v580_v35  ;;  %v594_v57 = vld [vmem:[#allocation3 + $0x140] sm:$0xff] }
  0x79   :  { %2674 = vmatprep.subr.bf16.mxu0 %v3872_v38  ;;  %v3895_v53 = vpack.c.bf16 %v593_v37, %v589_v16  ;;  %v588_v54 = vld [vmem:[#allocation3 + $0x110] sm:$0xff]  ;;  %v3898_v14 = vpack.c.bf16 %v599_v15, %v595_v50  ;;  %v598_v13 = vld [vmem:[#allocation3 + $0x160] sm:$0xff]  ;;  %v597_v12 = vld [vmem:[#allocation3 + $0x158] sm:$0xff] }
  0x7a   :  { %2704 = vmatpush1.bf16.msra.mxu1 %v3877_v51  ;;  %v592_v55 = vld [vmem:[#allocation3 + $0x130] sm:$0xff]  ;;  %v601_v11 = vld [vmem:[#allocation3 + $0x178] sm:$0xff]  ;;  %v603_v35 = vld [vmem:[#allocation3 + $0x188] sm:$0xff]  ;;  %v3904_v59 = vpack.c.bf16 %v598_v13, %v594_v57 }
  0x7b   :  { %2706 = vmatprep.subr.bf16.mxu1 %v3883_v62  ;;  %v607_v36 = vld [vmem:[#allocation3 + $0x1a8] sm:$0xff]  ;;  %v3901_v39 = vpack.c.bf16 %v592_v55, %v588_v54  ;;  %v602_v16 = vld [vmem:[#allocation3 + $0x180] sm:$0xff]  ;;  %v3907_v37 = vpack.c.bf16 %v601_v11, %v597_v12  ;;  %v596_v15 = vld [vmem:[#allocation3 + $0x150] sm:$0xff] }
  0x7c   :  { %2676 = vmatpush1.bf16.msra.mxu0 %v3880_v58  ;;  %v600_v50 = vld [vmem:[#allocation3 + $0x170] sm:$0xff]  ;;  %v3910_v10 = vpack.c.bf16 %v607_v36, %v603_v35  ;;  %v606_v9 = vld [vmem:[#allocation3 + $0x1a0] sm:$0xff]  ;;  %v605_v8 = vld [vmem:[#allocation3 + $0x198] sm:$0xff] }
  0x7d   :  { %2678 = vmatprep.subr.bf16.mxu0 %v3886_v34  ;;  %v609_v7 = vld [vmem:[#allocation3 + $0x1b8] sm:$0xff]  ;;  %v611_v54 = vld [vmem:[#allocation3 + $0x1c8] sm:$0xff]  ;;  %v3913_v13 = vpack.c.bf16 %v600_v50, %v596_v15  ;;  %v3916_v57 = vpack.c.bf16 %v606_v9, %v602_v16  ;;  %v610_v11 = vld [vmem:[#allocation3 + $0x1c0] sm:$0xff] }
  0x7e   :  { %2708 = vmatpush1.bf16.msra.mxu1 %v3889_v40  ;;  %v615_v55 = vld [vmem:[#allocation3 + $0x1e8] sm:$0xff]  ;;  %v3919_v12 = vpack.c.bf16 %v609_v7, %v605_v8  ;;  %v604_v35 = vld [vmem:[#allocation3 + $0x190] sm:$0xff]  ;;  %v614_v5 = vld [vmem:[#allocation3 + $0x1e0] sm:$0xff] }
  0x7f   :  { %2710 = vmatprep.subr.bf16.mxu1 %v3895_v53  ;;  %v608_v36 = vld [vmem:[#allocation3 + $0x1b0] sm:$0xff]  ;;  %v3922_v6 = vpack.c.bf16 %v615_v55, %v611_v54  ;;  %v613_v4 = vld [vmem:[#allocation3 + $0x1d8] sm:$0xff]  ;;  %v3928_v9 = vpack.c.bf16 %v614_v5, %v610_v11  ;;  %v4401_v5 = vmov 0.0  }
  0x80   :  { %2680 = vmatpush1.bf16.msra.mxu0 %v3892_v41  ;;  %v617_v3 = vld [vmem:[#allocation3 + $0x1f8] sm:$0xff]  ;;  %v3925_v15 = vpack.c.bf16 %v608_v36, %v604_v35  ;;  %v612_v8 = vld [vmem:[#allocation3 + $0x1d0] sm:$0xff] }
  0x81   :  { %2682 = vmatprep.subr.bf16.mxu0 %v3898_v14  ;;  %v3931_v7 = vpack.c.bf16 %v617_v3, %v613_v4  ;;  %v616_v16 = vld [vmem:[#allocation3 + $0x1f0] sm:$0xff] }
  0x82   :  { %2712 = vmatpush1.bf16.msra.mxu1 %v3901_v39  ;;  %v3935_v50 = vpack.c.bf16 %v616_v16, %v612_v8 }
  0x83   :  { %2714 = vmatprep.subr.bf16.mxu1 %v3907_v37 }
  0x84   :  { %2684 = vmatpush1.bf16.msra.mxu0 %v3904_v59 }
  0x85   :  { %2686 = vmatprep.subr.bf16.mxu0 %v3910_v10 }
  0x86   :  { %2716 = vmatpush1.bf16.msra.mxu1 %v3913_v13 }
  0x87   :  { %2718 = vmatprep.subr.bf16.mxu1 %v3919_v12 }
  0x88   :  { %2688 = vmatpush1.bf16.msra.mxu0 %v3916_v57 }
  0x89   :  { %2690 = vmatprep.subr.bf16.mxu0 %v3922_v6 }
  0x8a   :  { %2720 = vmatpush1.bf16.msra.mxu1 %v3925_v15 }
  0x8b   :  { %2722 = vmatprep.subr.bf16.mxu1 %v3931_v7 }
  0x8c   :  { %2692 = vmatpush1.bf16.msra.mxu0 %v3928_v9 }
  0x8d   :  { %2726 = vmatprep.subr.bf16.mxu0 %v3844_v60 }
  0x8e   :  { %2724 = vmatpush1.bf16.msra.mxu1 %v3935_v50 }
  0x8f   :  { %683 = vmatmul.mubr.f32.vlgmr.msra.gmra.mrb[0].mxu0 %v4401_v5  ;;  %2758 = vmatprep.subr.bf16.mxu1 %v3854_v43 }
  0x90   :  { %2728 = vmatpush1.bf16.msra.mxu0 %v3846_v0  ;;  %850 = vmatprep.mubr.f32.mxu0 %v4401_v5 }
  0x91   :  { %2730 = vmatprep.subr.bf16.mxu0 %v3848_v33  ;;  %754 = vmatmul.mubr.f32.vlgmr.msra.gmra.mrb[0].mxu1 %v4401_v5 }
  0x92   :  { %2760 = vmatpush1.bf16.msra.mxu1 %v3856_v44  ;;  %921 = vmatprep.mubr.f32.mxu1 %v4401_v5 }
  0x93   :  { %2762 = vmatprep.subr.bf16.mxu1 %v3862_v56 }
  0x94   :  { %2732 = vmatpush1.bf16.msra.mxu0 %v3852_v42 }
  0x95   :  { %2734 = vmatprep.subr.bf16.mxu0 %v3859_v52 }
  0x96   :  { %2764 = vmatpush1.bf16.msra.mxu1 %v3865_v61 }
  0x97   :  { %2766 = vmatprep.subr.bf16.mxu1 %v3874_v45 }
  0x98   :  { %2736 = vmatpush1.bf16.msra.mxu0 %v3868_v63 }
  0x99   :  { %2738 = vmatprep.subr.bf16.mxu0 %v3872_v38 }
  0x9a   :  { %2768 = vmatpush1.bf16.msra.mxu1 %v3877_v51 }
  0x9b   :  { %2770 = vmatprep.subr.bf16.mxu1 %v3883_v62 }
  0x9c   :  { %2740 = vmatpush1.bf16.msra.mxu0 %v3880_v58 }
  0x9d   :  { %2742 = vmatprep.subr.bf16.mxu0 %v3886_v34 }
  0x9e   :  { %2772 = vmatpush1.bf16.msra.mxu1 %v3889_v40 }
  0x9f   :  { %2774 = vmatprep.subr.bf16.mxu1 %v3895_v53 }
  0xa0   :  { %2744 = vmatpush1.bf16.msra.mxu0 %v3892_v41 }
  0xa1   :  { %2746 = vmatprep.subr.bf16.mxu0 %v3898_v14 }
  0xa2   :  { %2776 = vmatpush1.bf16.msra.mxu1 %v3901_v39 }
  0xa3   :  { %2778 = vmatprep.subr.bf16.mxu1 %v3907_v37 }
  0xa4   :  { %2748 = vmatpush1.bf16.msra.mxu0 %v3904_v59 }
  0xa5   :  { %2750 = vmatprep.subr.bf16.mxu0 %v3910_v10 }
  0xa6   :  { %2780 = vmatpush1.bf16.msra.mxu1 %v3913_v13 }
  0xa7   :  { %2782 = vmatprep.subr.bf16.mxu1 %v3919_v12 }
  0xa8   :  { %2752 = vmatpush1.bf16.msra.mxu0 %v3916_v57 }
  0xa9   :  { %2754 = vmatprep.subr.bf16.mxu0 %v3922_v6 }
  0xaa   :  { %2784 = vmatpush1.bf16.msra.mxu1 %v3925_v15 }
  0xab   :  { %2786 = vmatprep.subr.bf16.mxu1 %v3931_v7 }
  0xac   :  { %2756 = vmatpush1.bf16.msra.mxu0 %v3928_v9 }
  0xad   :  { %2790 = vmatprep.subr.bf16.mxu0 %v3844_v60 }
  0xae   :  { %2788 = vmatpush1.bf16.msra.mxu1 %v3935_v50 }
  0xaf   :  { %2822 = vmatprep.subr.bf16.mxu1 %v3854_v43 }
 0x162   :  { %v684_v3 = vpop.f32.mrb[0].mxu0 }
 0x163   :  { %v3269_v4 = vadd.f32 %v684_v3, %v3784_v46  ;;  %v686_v54 = vpop.f32.mrb[1].mxu0 }
 0x164   :  { %v3270_v55 = vadd.f32 %v686_v54, %v3786_v47  ;;  %v755_v35 = vpop.f32.mrb[0].mxu1 }
 0x165   :  { %v764_v11 = vmul.f32 0.5, %v3269_v4  ;;  %v3285_v8 = vadd.f32 %v755_v35, %v3788_v48  ;;  %v757_v16 = vpop.f32.mrb[1].mxu1 }
 0x166   :  { %v768_v36 = vmul.f32 0.5, %v3270_v55  ;;  %v3286_v2 = vadd.f32 %v757_v16, %v3790_v49 }
 0x167   :  { %3344 = vtanh.f32 %v764_v11 }
 0x168   :  { %3346 = vtanh.f32 %v768_v36  ;;  %v773_v1 = vmul.f32 0.5, %v3286_v2 }
 0x169   :  { %3348 = vtanh.f32 %v3285_v8 }
 0x16a   :  { %3350 = vtanh.f32 %v773_v1 }
 0x171   :  { %v3345_v32 = vpop.eup %3344 }
 0x172   :  { %v3347_v31 = vpop.eup %3346  ;;  %v766_v30 = vmul.f32 0.5, %v3345_v32 }
 0x173   :  { %v3349_v29 = vpop.eup %3348  ;;  %v770_v3 = vmul.f32 0.5, %v3347_v31 }
 0x174   :  { %v767_v28 = vadd.f32 0.5, %v766_v30  ;;  %v3351_v11 = vpop.eup %3350 }
 0x175   :  { %v771_v54 = vadd.f32 0.5, %v770_v3  ;;  %v775_v35 = vmul.f32 0.5, %v3351_v11 }
 0x176   :  { %v778_v4 = vmul.f32 %v3349_v29, %v767_v28 }
 0x177   :  { %v777_v27 = vmul.f32 0.0, %v771_v54  ;;  %v776_v36 = vadd.f32 0.5, %v775_v35 }
 0x179   :  { %v3982_v55 = vadd.f32 %v778_v4, %v777_v27 }
 0x17b   :  { %3352 = vtanh.f32 %v3982_v55 }
 0x185   :  { %v3353_v8 = vpop.eup %3352 }
 0x186   :  { %v781_v16 = vmul.f32 %v3353_v8, %v776_v36 }
 0x188   :  { %851 = vmatmul.mubr.f32.vlgmr.msra.gmra.mrb[2].mxu0 %v781_v16  ;;  %922 = vmatmul.mubr.f32.vlgmr.msra.gmra.mrb[2].mxu1 %v781_v16 }
 0x189   :  { %2792 = vmatpush1.bf16.msra.mxu0 %v3846_v0  ;;  %2824 = vmatpush1.bf16.msra.mxu1 %v3856_v44 }
 0x18a   :  { %2794 = vmatprep.subr.bf16.mxu0 %v3848_v33  ;;  %2826 = vmatprep.subr.bf16.mxu1 %v3862_v56 }
 0x18b   :  { %1018 = vmatprep.mubr.f32.mxu0 %v4401_v5  ;;  %1089 = vmatprep.mubr.f32.mxu1 %v4401_v5 }
 0x18d   :  { %2796 = vmatpush1.bf16.msra.mxu0 %v3852_v42  ;;  %2828 = vmatpush1.bf16.msra.mxu1 %v3865_v61 }
 0x18e   :  { %2798 = vmatprep.subr.bf16.mxu0 %v3859_v52  ;;  %2830 = vmatprep.subr.bf16.mxu1 %v3874_v45 }
 0x191   :  { %2800 = vmatpush1.bf16.msra.mxu0 %v3868_v63  ;;  %2832 = vmatpush1.bf16.msra.mxu1 %v3877_v51 }
 0x192   :  { %2802 = vmatprep.subr.bf16.mxu0 %v3872_v38  ;;  %2834 = vmatprep.subr.bf16.mxu1 %v3883_v62 }
 0x195   :  { %2804 = vmatpush1.bf16.msra.mxu0 %v3880_v58  ;;  %2836 = vmatpush1.bf16.msra.mxu1 %v3889_v40 }
 0x196   :  { %2806 = vmatprep.subr.bf16.mxu0 %v3886_v34  ;;  %2838 = vmatprep.subr.bf16.mxu1 %v3895_v53 }
 0x199   :  { %2808 = vmatpush1.bf16.msra.mxu0 %v3892_v41  ;;  %2840 = vmatpush1.bf16.msra.mxu1 %v3901_v39 }
 0x19a   :  { %2810 = vmatprep.subr.bf16.mxu0 %v3898_v14  ;;  %2842 = vmatprep.subr.bf16.mxu1 %v3907_v37 }
 0x19d   :  { %2812 = vmatpush1.bf16.msra.mxu0 %v3904_v59  ;;  %2844 = vmatpush1.bf16.msra.mxu1 %v3913_v13 }
 0x19e   :  { %2814 = vmatprep.subr.bf16.mxu0 %v3910_v10  ;;  %2846 = vmatprep.subr.bf16.mxu1 %v3919_v12 }
 0x1a1   :  { %2816 = vmatpush1.bf16.msra.mxu0 %v3916_v57  ;;  %2848 = vmatpush1.bf16.msra.mxu1 %v3925_v15 }
 0x1a2   :  { %2818 = vmatprep.subr.bf16.mxu0 %v3922_v6  ;;  %2850 = vmatprep.subr.bf16.mxu1 %v3931_v7 }
 0x1a5   :  { %2820 = vmatpush1.bf16.msra.mxu0 %v3928_v9  ;;  %2852 = vmatpush1.bf16.msra.mxu1 %v3935_v50 }
 0x1a6   :  { %2854 = vmatprep.subr.bf16.mxu0 %v3844_v60  ;;  %2886 = vmatprep.subr.bf16.mxu1 %v3854_v43 }
 0x25b   :  { %v852_v1 = vpop.f32.mrb[2].mxu0  ;;  %v923_v2 = vpop.f32.mrb[2].mxu1 }
 0x25c   :  { %v3271_v27 = vadd.f32 %v852_v1, %v3784_v46  ;;  %v854_v28 = vpop.f32.mrb[3].mxu0  ;;  %v925_v29 = vpop.f32.mrb[3].mxu1  ;;  %v3287_v3 = vadd.f32 %v923_v2, %v3788_v48 }
 0x25d   :  { %v3272_v30 = vadd.f32 %v854_v28, %v3786_v47  ;;  %v3288_v54 = vadd.f32 %v925_v29, %v3790_v49 }
 0x25e   :  { %v932_v31 = vmul.f32 0.5, %v3271_v27 }
 0x25f   :  { %v936_v32 = vmul.f32 0.5, %v3272_v30  ;;  %v941_v4 = vmul.f32 0.5, %v3288_v54 }
 0x260   :  { %3354 = vtanh.f32 %v932_v31 }
 0x261   :  { %3356 = vtanh.f32 %v936_v32 }
 0x262   :  { %3358 = vtanh.f32 %v3287_v3 }
 0x263   :  { %3360 = vtanh.f32 %v941_v4 }
 0x26a   :  { %v3355_v11 = vpop.eup %3354 }
 0x26b   :  { %v3357_v35 = vpop.eup %3356  ;;  %v934_v36 = vmul.f32 0.5, %v3355_v11 }
 0x26c   :  { %v938_v8 = vmul.f32 0.5, %v3357_v35  ;;  %v3359_v1 = vpop.eup %3358 }
 0x26d   :  { %v935_v16 = vadd.f32 0.5, %v934_v36  ;;  %v3361_v2 = vpop.eup %3360 }
 0x26e   :  { %v939_v26 = vadd.f32 0.5, %v938_v8  ;;  %v943_v30 = vmul.f32 0.5, %v3361_v2 }
 0x26f   :  { %v946_v25 = vmul.f32 %v3359_v1, %v935_v16 }
 0x270   :  { %v945_v27 = vmul.f32 %v939_v26, %v3982_v55  ;;  %v944_v31 = vadd.f32 0.5, %v943_v30 }
 0x272   :  { %v4024_v28 = vadd.f32 %v946_v25, %v945_v27 }
 0x274   :  { %3362 = vtanh.f32 %v4024_v28 }
 0x27e   :  { %v3363_v29 = vpop.eup %3362 }
 0x27f   :  { %v949_v32 = vmul.f32 %v3363_v29, %v944_v31 }
 0x281   :  { %1019 = vmatmul.mubr.f32.vlgmr.msra.gmra.mrb[4].mxu0 %v949_v32  ;;  %1090 = vmatmul.mubr.f32.vlgmr.msra.gmra.mrb[4].mxu1 %v949_v32 }
 0x282   :  { %2856 = vmatpush1.bf16.msra.mxu0 %v3846_v0  ;;  %2888 = vmatpush1.bf16.msra.mxu1 %v3856_v44 }
 0x283   :  { %2858 = vmatprep.subr.bf16.mxu0 %v3848_v33  ;;  %2890 = vmatprep.subr.bf16.mxu1 %v3862_v56 }
 0x284   :  { %1186 = vmatprep.mubr.f32.mxu0 %v4401_v5  ;;  %1257 = vmatprep.mubr.f32.mxu1 %v4401_v5 }
 0x286   :  { %2860 = vmatpush1.bf16.msra.mxu0 %v3852_v42  ;;  %2892 = vmatpush1.bf16.msra.mxu1 %v3865_v61 }
 0x287   :  { %2862 = vmatprep.subr.bf16.mxu0 %v3859_v52  ;;  %2894 = vmatprep.subr.bf16.mxu1 %v3874_v45 }
 0x28a   :  { %2864 = vmatpush1.bf16.msra.mxu0 %v3868_v63  ;;  %2896 = vmatpush1.bf16.msra.mxu1 %v3877_v51 }
 0x28b   :  { %2866 = vmatprep.subr.bf16.mxu0 %v3872_v38  ;;  %2898 = vmatprep.subr.bf16.mxu1 %v3883_v62 }
 0x28e   :  { %2868 = vmatpush1.bf16.msra.mxu0 %v3880_v58  ;;  %2900 = vmatpush1.bf16.msra.mxu1 %v3889_v40 }
 0x28f   :  { %2870 = vmatprep.subr.bf16.mxu0 %v3886_v34  ;;  %2902 = vmatprep.subr.bf16.mxu1 %v3895_v53 }
 0x292   :  { %2872 = vmatpush1.bf16.msra.mxu0 %v3892_v41  ;;  %2904 = vmatpush1.bf16.msra.mxu1 %v3901_v39 }
 0x293   :  { %2874 = vmatprep.subr.bf16.mxu0 %v3898_v14  ;;  %2906 = vmatprep.subr.bf16.mxu1 %v3907_v37 }
 0x296   :  { %2876 = vmatpush1.bf16.msra.mxu0 %v3904_v59  ;;  %2908 = vmatpush1.bf16.msra.mxu1 %v3913_v13 }
 0x297   :  { %2878 = vmatprep.subr.bf16.mxu0 %v3910_v10  ;;  %2910 = vmatprep.subr.bf16.mxu1 %v3919_v12 }
 0x29a   :  { %2880 = vmatpush1.bf16.msra.mxu0 %v3916_v57  ;;  %2912 = vmatpush1.bf16.msra.mxu1 %v3925_v15 }
 0x29b   :  { %2882 = vmatprep.subr.bf16.mxu0 %v3922_v6  ;;  %2914 = vmatprep.subr.bf16.mxu1 %v3931_v7 }
 0x29e   :  { %2884 = vmatpush1.bf16.msra.mxu0 %v3928_v9  ;;  %2916 = vmatpush1.bf16.msra.mxu1 %v3935_v50 }
 0x29f   :  { %2918 = vmatprep.subr.bf16.mxu0 %v3844_v60  ;;  %2950 = vmatprep.subr.bf16.mxu1 %v3854_v43 }
 0x354   :  { %v1020_v25 = vpop.f32.mrb[4].mxu0  ;;  %v1091_v26 = vpop.f32.mrb[4].mxu1 }
 0x355   :  { %v3273_v55 = vadd.f32 %v1020_v25, %v3784_v46  ;;  %v1022_v3 = vpop.f32.mrb[5].mxu0  ;;  %v1093_v54 = vpop.f32.mrb[5].mxu1  ;;  %v3289_v36 = vadd.f32 %v1091_v26, %v3788_v48 }
 0x356   :  { %v3274_v4 = vadd.f32 %v1022_v3, %v3786_v47  ;;  %v3290_v8 = vadd.f32 %v1093_v54, %v3790_v49 }
 0x357   :  { %v1100_v11 = vmul.f32 0.5, %v3273_v55 }
 0x358   :  { %v1104_v35 = vmul.f32 0.5, %v3274_v4  ;;  %v1109_v16 = vmul.f32 0.5, %v3290_v8 }
 0x359   :  { %3364 = vtanh.f32 %v1100_v11 }
 0x35a   :  { %3366 = vtanh.f32 %v1104_v35 }
 0x35b   :  { %3368 = vtanh.f32 %v3289_v36 }
 0x35c   :  { %3370 = vtanh.f32 %v1109_v16 }
 0x363   :  { %v3365_v1 = vpop.eup %3364 }
 0x364   :  { %v3367_v27 = vpop.eup %3366  ;;  %v1102_v2 = vmul.f32 0.5, %v3365_v1 }
 0x365   :  { %v1106_v30 = vmul.f32 0.5, %v3367_v27  ;;  %v3369_v29 = vpop.eup %3368 }
 0x366   :  { %v1103_v31 = vadd.f32 0.5, %v1102_v2  ;;  %v3371_v26 = vpop.eup %3370 }
 0x367   :  { %v1107_v32 = vadd.f32 0.5, %v1106_v30  ;;  %v1111_v4 = vmul.f32 0.5, %v3371_v26 }
 0x368   :  { %v1114_v25 = vmul.f32 %v3369_v29, %v1103_v31 }
 0x369   :  { %v1113_v55 = vmul.f32 %v1107_v32, %v4024_v28  ;;  %v1112_v11 = vadd.f32 0.5, %v1111_v4 }
 0x36b   :  { %v4066_v3 = vadd.f32 %v1114_v25, %v1113_v55 }
 0x36d   :  { %3372 = vtanh.f32 %v4066_v3 }
 0x377   :  { %v3373_v54 = vpop.eup %3372 }
 0x378   :  { %v1117_v35 = vmul.f32 %v3373_v54, %v1112_v11 }
 0x37a   :  { %1187 = vmatmul.mubr.f32.vlgmr.msra.gmra.mrb[6].mxu0 %v1117_v35  ;;  %1258 = vmatmul.mubr.f32.vlgmr.msra.gmra.mrb[6].mxu1 %v1117_v35 }
 0x37b   :  { %2920 = vmatpush1.bf16.msra.mxu0 %v3846_v0  ;;  %2952 = vmatpush1.bf16.msra.mxu1 %v3856_v44 }
 0x37c   :  { %2922 = vmatprep.subr.bf16.mxu0 %v3848_v33  ;;  %2954 = vmatprep.subr.bf16.mxu1 %v3862_v56 }
 0x37d   :  { %1354 = vmatprep.mubr.f32.mxu0 %v4401_v5  ;;  %1425 = vmatprep.mubr.f32.mxu1 %v4401_v5 }
 0x37f   :  { %2924 = vmatpush1.bf16.msra.mxu0 %v3852_v42  ;;  %2956 = vmatpush1.bf16.msra.mxu1 %v3865_v61 }
 0x380   :  { %2926 = vmatprep.subr.bf16.mxu0 %v3859_v52  ;;  %2958 = vmatprep.subr.bf16.mxu1 %v3874_v45 }
 0x383   :  { %2928 = vmatpush1.bf16.msra.mxu0 %v3868_v63  ;;  %2960 = vmatpush1.bf16.msra.mxu1 %v3877_v51 }
 0x384   :  { %2930 = vmatprep.subr.bf16.mxu0 %v3872_v38  ;;  %2962 = vmatprep.subr.bf16.mxu1 %v3883_v62 }
 0x387   :  { %2932 = vmatpush1.bf16.msra.mxu0 %v3880_v58  ;;  %2964 = vmatpush1.bf16.msra.mxu1 %v3889_v40 }
 0x388   :  { %2934 = vmatprep.subr.bf16.mxu0 %v3886_v34  ;;  %2966 = vmatprep.subr.bf16.mxu1 %v3895_v53 }
 0x38b   :  { %2936 = vmatpush1.bf16.msra.mxu0 %v3892_v41  ;;  %2968 = vmatpush1.bf16.msra.mxu1 %v3901_v39 }
 0x38c   :  { %2938 = vmatprep.subr.bf16.mxu0 %v3898_v14  ;;  %2970 = vmatprep.subr.bf16.mxu1 %v3907_v37 }
 0x38f   :  { %2940 = vmatpush1.bf16.msra.mxu0 %v3904_v59  ;;  %2972 = vmatpush1.bf16.msra.mxu1 %v3913_v13 }
 0x390   :  { %2942 = vmatprep.subr.bf16.mxu0 %v3910_v10  ;;  %2974 = vmatprep.subr.bf16.mxu1 %v3919_v12 }
 0x393   :  { %2944 = vmatpush1.bf16.msra.mxu0 %v3916_v57  ;;  %2976 = vmatpush1.bf16.msra.mxu1 %v3925_v15 }
 0x394   :  { %2946 = vmatprep.subr.bf16.mxu0 %v3922_v6  ;;  %2978 = vmatprep.subr.bf16.mxu1 %v3931_v7 }
 0x397   :  { %2948 = vmatpush1.bf16.msra.mxu0 %v3928_v9  ;;  %2980 = vmatpush1.bf16.msra.mxu1 %v3935_v50 }
 0x398   :  { %2982 = vmatprep.subr.bf16.mxu0 %v3844_v60  ;;  %3014 = vmatprep.subr.bf16.mxu1 %v3854_v43 }
 0x44d   :  { %v1188_v28 = vpop.f32.mrb[6].mxu0  ;;  %v1259_v36 = vpop.f32.mrb[6].mxu1 }
 0x44e   :  { %v3275_v8 = vadd.f32 %v1188_v28, %v3784_v46  ;;  %v1190_v16 = vpop.f32.mrb[7].mxu0  ;;  %v1261_v1 = vpop.f32.mrb[7].mxu1  ;;  %v3291_v31 = vadd.f32 %v1259_v36, %v3788_v48 }
 0x44f   :  { %v3276_v27 = vadd.f32 %v1190_v16, %v3786_v47  ;;  %v3292_v29 = vadd.f32 %v1261_v1, %v3790_v49 }
 0x450   :  { %v1268_v2 = vmul.f32 0.5, %v3275_v8 }
 0x451   :  { %v1272_v30 = vmul.f32 0.5, %v3276_v27  ;;  %v1277_v32 = vmul.f32 0.5, %v3292_v29 }
 0x452   :  { %3374 = vtanh.f32 %v1268_v2 }
 0x453   :  { %3376 = vtanh.f32 %v1272_v30 }
 0x454   :  { %3378 = vtanh.f32 %v3291_v31 }
 0x455   :  { %3380 = vtanh.f32 %v1277_v32 }
 0x45c   :  { %v3375_v25 = vpop.eup %3374 }
 0x45d   :  { %v3377_v55 = vpop.eup %3376  ;;  %v1270_v26 = vmul.f32 0.5, %v3375_v25 }
 0x45e   :  { %v1274_v4 = vmul.f32 0.5, %v3377_v55  ;;  %v3379_v54 = vpop.eup %3378 }
 0x45f   :  { %v1271_v11 = vadd.f32 0.5, %v1270_v26  ;;  %v3381_v36 = vpop.eup %3380 }
 0x460   :  { %v1275_v35 = vadd.f32 0.5, %v1274_v4  ;;  %v1279_v27 = vmul.f32 0.5, %v3381_v36 }
 0x461   :  { %v1282_v28 = vmul.f32 %v3379_v54, %v1271_v11 }
 0x462   :  { %v1281_v8 = vmul.f32 %v1275_v35, %v4066_v3  ;;  %v1280_v2 = vadd.f32 0.5, %v1279_v27 }
 0x464   :  { %v4108_v16 = vadd.f32 %v1282_v28, %v1281_v8 }
 0x466   :  { %3382 = vtanh.f32 %v4108_v16 }
 0x470   :  { %v3383_v1 = vpop.eup %3382 }
 0x471   :  { %v1285_v30 = vmul.f32 %v3383_v1, %v1280_v2 }
 0x473   :  { %1355 = vmatmul.mubr.f32.vlgmr.msra.gmra.mrb[8].mxu0 %v1285_v30  ;;  %1426 = vmatmul.mubr.f32.vlgmr.msra.gmra.mrb[8].mxu1 %v1285_v30 }
 0x474   :  { %2984 = vmatpush1.bf16.msra.mxu0 %v3846_v0  ;;  %3016 = vmatpush1.bf16.msra.mxu1 %v3856_v44 }
 0x475   :  { %2986 = vmatprep.subr.bf16.mxu0 %v3848_v33  ;;  %3018 = vmatprep.subr.bf16.mxu1 %v3862_v56 }
 0x476   :  { %1522 = vmatprep.mubr.f32.mxu0 %v4401_v5  ;;  %1593 = vmatprep.mubr.f32.mxu1 %v4401_v5 }
 0x478   :  { %2988 = vmatpush1.bf16.msra.mxu0 %v3852_v42  ;;  %3020 = vmatpush1.bf16.msra.mxu1 %v3865_v61 }
 0x479   :  { %2990 = vmatprep.subr.bf16.mxu0 %v3859_v52  ;;  %3022 = vmatprep.subr.bf16.mxu1 %v3874_v45 }
 0x47c   :  { %2992 = vmatpush1.bf16.msra.mxu0 %v3868_v63  ;;  %3024 = vmatpush1.bf16.msra.mxu1 %v3877_v51 }
 0x47d   :  { %2994 = vmatprep.subr.bf16.mxu0 %v3872_v38  ;;  %3026 = vmatprep.subr.bf16.mxu1 %v3883_v62 }
 0x480   :  { %2996 = vmatpush1.bf16.msra.mxu0 %v3880_v58  ;;  %3028 = vmatpush1.bf16.msra.mxu1 %v3889_v40 }
 0x481   :  { %2998 = vmatprep.subr.bf16.mxu0 %v3886_v34  ;;  %3030 = vmatprep.subr.bf16.mxu1 %v3895_v53 }
 0x484   :  { %3000 = vmatpush1.bf16.msra.mxu0 %v3892_v41  ;;  %3032 = vmatpush1.bf16.msra.mxu1 %v3901_v39 }
 0x485   :  { %3002 = vmatprep.subr.bf16.mxu0 %v3898_v14  ;;  %3034 = vmatprep.subr.bf16.mxu1 %v3907_v37 }
 0x488   :  { %3004 = vmatpush1.bf16.msra.mxu0 %v3904_v59  ;;  %3036 = vmatpush1.bf16.msra.mxu1 %v3913_v13 }
 0x489   :  { %3006 = vmatprep.subr.bf16.mxu0 %v3910_v10  ;;  %3038 = vmatprep.subr.bf16.mxu1 %v3919_v12 }
 0x48c   :  { %3008 = vmatpush1.bf16.msra.mxu0 %v3916_v57  ;;  %3040 = vmatpush1.bf16.msra.mxu1 %v3925_v15 }
 0x48d   :  { %3010 = vmatprep.subr.bf16.mxu0 %v3922_v6  ;;  %3042 = vmatprep.subr.bf16.mxu1 %v3931_v7 }
 0x490   :  { %3012 = vmatpush1.bf16.msra.mxu0 %v3928_v9  ;;  %3044 = vmatpush1.bf16.msra.mxu1 %v3935_v50 }
 0x491   :  { %3046 = vmatprep.subr.bf16.mxu0 %v3844_v60  ;;  %3078 = vmatprep.subr.bf16.mxu1 %v3854_v43 }
 0x546   :  { %v1356_v3 = vpop.f32.mrb[8].mxu0  ;;  %v1427_v31 = vpop.f32.mrb[8].mxu1 }
 0x547   :  { %v3277_v29 = vadd.f32 %v1356_v3, %v3784_v46  ;;  %v1358_v32 = vpop.f32.mrb[9].mxu0  ;;  %v1429_v25 = vpop.f32.mrb[9].mxu1  ;;  %v3293_v11 = vadd.f32 %v1427_v31, %v3788_v48 }
 0x548   :  { %v3278_v55 = vadd.f32 %v1358_v32, %v3786_v47  ;;  %v3294_v54 = vadd.f32 %v1429_v25, %v3790_v49 }
 0x549   :  { %v1436_v26 = vmul.f32 0.5, %v3277_v29 }
 0x54a   :  { %v1440_v4 = vmul.f32 0.5, %v3278_v55  ;;  %v1445_v35 = vmul.f32 0.5, %v3294_v54 }
 0x54b   :  { %3384 = vtanh.f32 %v1436_v26 }
 0x54c   :  { %3386 = vtanh.f32 %v1440_v4 }
 0x54d   :  { %3388 = vtanh.f32 %v3293_v11 }
 0x54e   :  { %3390 = vtanh.f32 %v1445_v35 }
 0x555   :  { %v3385_v28 = vpop.eup %3384 }
 0x556   :  { %v3387_v8 = vpop.eup %3386  ;;  %v1438_v36 = vmul.f32 0.5, %v3385_v28 }
 0x557   :  { %v1442_v27 = vmul.f32 0.5, %v3387_v8  ;;  %v3389_v1 = vpop.eup %3388 }
 0x558   :  { %v1439_v2 = vadd.f32 0.5, %v1438_v36  ;;  %v3391_v31 = vpop.eup %3390 }
 0x559   :  { %v1443_v30 = vadd.f32 0.5, %v1442_v27  ;;  %v1447_v55 = vmul.f32 0.5, %v3391_v31 }
 0x55a   :  { %v1450_v3 = vmul.f32 %v3389_v1, %v1439_v2 }
 0x55b   :  { %v1449_v29 = vmul.f32 %v1443_v30, %v4108_v16  ;;  %v1448_v26 = vadd.f32 0.5, %v1447_v55 }
 0x55d   :  { %v4150_v32 = vadd.f32 %v1450_v3, %v1449_v29 }
 0x55f   :  { %3392 = vtanh.f32 %v4150_v32 }
 0x569   :  { %v3393_v25 = vpop.eup %3392 }
 0x56a   :  { %v1453_v4 = vmul.f32 %v3393_v25, %v1448_v26 }
 0x56c   :  { %1523 = vmatmul.mubr.f32.vlgmr.msra.gmra.mrb[10].mxu0 %v1453_v4  ;;  %1594 = vmatmul.mubr.f32.vlgmr.msra.gmra.mrb[10].mxu1 %v1453_v4 }
 0x56d   :  { %3048 = vmatpush1.bf16.msra.mxu0 %v3846_v0  ;;  %3080 = vmatpush1.bf16.msra.mxu1 %v3856_v44 }
 0x56e   :  { %3050 = vmatprep.subr.bf16.mxu0 %v3848_v33  ;;  %3082 = vmatprep.subr.bf16.mxu1 %v3862_v56 }
 0x56f   :  { %1690 = vmatprep.mubr.f32.mxu0 %v4401_v5  ;;  %1761 = vmatprep.mubr.f32.mxu1 %v4401_v5 }
 0x571   :  { %3052 = vmatpush1.bf16.msra.mxu0 %v3852_v42  ;;  %3084 = vmatpush1.bf16.msra.mxu1 %v3865_v61 }
 0x572   :  { %3054 = vmatprep.subr.bf16.mxu0 %v3859_v52  ;;  %3086 = vmatprep.subr.bf16.mxu1 %v3874_v45 }
 0x575   :  { %3056 = vmatpush1.bf16.msra.mxu0 %v3868_v63  ;;  %3088 = vmatpush1.bf16.msra.mxu1 %v3877_v51 }
 0x576   :  { %3058 = vmatprep.subr.bf16.mxu0 %v3872_v38  ;;  %3090 = vmatprep.subr.bf16.mxu1 %v3883_v62 }
 0x579   :  { %3060 = vmatpush1.bf16.msra.mxu0 %v3880_v58  ;;  %3092 = vmatpush1.bf16.msra.mxu1 %v3889_v40 }
 0x57a   :  { %3062 = vmatprep.subr.bf16.mxu0 %v3886_v34  ;;  %3094 = vmatprep.subr.bf16.mxu1 %v3895_v53 }
 0x57d   :  { %3064 = vmatpush1.bf16.msra.mxu0 %v3892_v41  ;;  %3096 = vmatpush1.bf16.msra.mxu1 %v3901_v39 }
 0x57e   :  { %3066 = vmatprep.subr.bf16.mxu0 %v3898_v14  ;;  %3098 = vmatprep.subr.bf16.mxu1 %v3907_v37 }
 0x581   :  { %3068 = vmatpush1.bf16.msra.mxu0 %v3904_v59  ;;  %3100 = vmatpush1.bf16.msra.mxu1 %v3913_v13 }
 0x582   :  { %3070 = vmatprep.subr.bf16.mxu0 %v3910_v10  ;;  %3102 = vmatprep.subr.bf16.mxu1 %v3919_v12 }
 0x585   :  { %3072 = vmatpush1.bf16.msra.mxu0 %v3916_v57  ;;  %3104 = vmatpush1.bf16.msra.mxu1 %v3925_v15 }
 0x586   :  { %3074 = vmatprep.subr.bf16.mxu0 %v3922_v6  ;;  %3106 = vmatprep.subr.bf16.mxu1 %v3931_v7 }
 0x589   :  { %3076 = vmatpush1.bf16.msra.mxu0 %v3928_v9  ;;  %3108 = vmatpush1.bf16.msra.mxu1 %v3935_v50 }
 0x58a   :  { %3110 = vmatprep.subr.bf16.mxu0 %v3844_v60  ;;  %3142 = vmatprep.subr.bf16.mxu1 %v3854_v43 }
 0x63f   :  { %v1524_v16 = vpop.f32.mrb[10].mxu0  ;;  %v1595_v11 = vpop.f32.mrb[10].mxu1 }
 0x640   :  { %v3279_v54 = vadd.f32 %v1524_v16, %v3784_v46  ;;  %v1526_v35 = vpop.f32.mrb[11].mxu0  ;;  %v1597_v28 = vpop.f32.mrb[11].mxu1  ;;  %v3295_v2 = vadd.f32 %v1595_v11, %v3788_v48 }
 0x641   :  { %v3280_v8 = vadd.f32 %v1526_v35, %v3786_v47  ;;  %v3296_v1 = vadd.f32 %v1597_v28, %v3790_v49 }
 0x642   :  { %v1604_v36 = vmul.f32 0.5, %v3279_v54 }
 0x643   :  { %v1608_v27 = vmul.f32 0.5, %v3280_v8  ;;  %v1613_v60 = vmul.f32 0.5, %v3296_v1 }
 0x644   :  { %3394 = vtanh.f32 %v1604_v36  ;;  %v4402_v36 = vlaneseq }
 0x645   :  { %3396 = vtanh.f32 %v1608_v27 }
 0x646   :  { %3398 = vtanh.f32 %v3295_v2  ;;  %v1959_v27 = vand.u32 127, %v4402_v36 }
 0x647   :  { %3400 = vtanh.f32 %v1613_v60 }
 0x64e   :  { %v3395_v30 = vpop.eup %3394 }
 0x64f   :  { %v3397_v43 = vpop.eup %3396  ;;  %v1606_v3 = vmul.f32 0.5, %v3395_v30 }
 0x650   :  { %v1610_v29 = vmul.f32 0.5, %v3397_v43  ;;  %v3399_v55 = vpop.eup %3398 }
 0x651   :  { %v1607_v31 = vadd.f32 0.5, %v1606_v3  ;;  %v3401_v11 = vpop.eup %3400 }
 0x652   :  { %v1611_v26 = vadd.f32 0.5, %v1610_v29  ;;  %v1615_v54 = vmul.f32 0.5, %v3401_v11 }
 0x653   :  { %v1618_v25 = vmul.f32 %v3399_v55, %v1607_v31 }
 0x654   :  { %v1617_v4 = vmul.f32 %v1611_v26, %v4150_v32  ;;  %v1616_v35 = vadd.f32 0.5, %v1615_v54 }
 0x656   :  { %v4192_v16 = vadd.f32 %v1618_v25, %v1617_v4 }
 0x658   :  { %3402 = vtanh.f32 %v4192_v16 }
 0x662   :  { %v3403_v28 = vpop.eup %3402 }
 0x663   :  { %v1621_v8 = vmul.f32 %v3403_v28, %v1616_v35 }
 0x665   :  { %1691 = vmatmul.mubr.f32.vlgmr.msra.gmra.mrb[12].mxu0 %v1621_v8  ;;  %1762 = vmatmul.mubr.f32.vlgmr.msra.gmra.mrb[12].mxu1 %v1621_v8 }
 0x666   :  { %3112 = vmatpush1.bf16.msra.mxu0 %v3846_v0  ;;  %3144 = vmatpush1.bf16.msra.mxu1 %v3856_v44  ;;  %v1963_v0 = vld [vmem:[%s4365_s4 + $0x18] sm:$0xff] }
 0x667   :  { %3114 = vmatprep.subr.bf16.mxu0 %v3848_v33  ;;  %3146 = vmatprep.subr.bf16.mxu1 %v3862_v56 }
 0x668   :  { %1858 = vmatprep.mubr.f32.mxu0 %v4401_v5  ;;  %1929 = vmatprep.mubr.f32.mxu1 %v4401_v5 }
 0x66a   :  { %3116 = vmatpush1.bf16.msra.mxu0 %v3852_v42  ;;  %3148 = vmatpush1.bf16.msra.mxu1 %v3865_v61 }
 0x66b   :  { %3118 = vmatprep.subr.bf16.mxu0 %v3859_v52  ;;  %3150 = vmatprep.subr.bf16.mxu1 %v3874_v45 }
 0x66e   :  { %3120 = vmatpush1.bf16.msra.mxu0 %v3868_v63  ;;  %3152 = vmatpush1.bf16.msra.mxu1 %v3877_v51 }
 0x66f   :  { %3122 = vmatprep.subr.bf16.mxu0 %v3872_v38  ;;  %3154 = vmatprep.subr.bf16.mxu1 %v3883_v62 }
 0x672   :  { %3124 = vmatpush1.bf16.msra.mxu0 %v3880_v58  ;;  %3156 = vmatpush1.bf16.msra.mxu1 %v3889_v40 }
 0x673   :  { %3126 = vmatprep.subr.bf16.mxu0 %v3886_v34  ;;  %3158 = vmatprep.subr.bf16.mxu1 %v3895_v53  ;;  %v3508_v34 = vmov 0  }
 0x674   :  { %3342 = vset.pattern.permute.xlu0 %v3508_v34  ;;  %3343 = vset.pattern.permute.xlu1 %v3508_v34 }
 0x676   :  { %3128 = vmatpush1.bf16.msra.mxu0 %v3892_v41  ;;  %3160 = vmatpush1.bf16.msra.mxu1 %v3901_v39 }
 0x677   :  { %3130 = vmatprep.subr.bf16.mxu0 %v3898_v14  ;;  %3162 = vmatprep.subr.bf16.mxu1 %v3907_v37  ;;  %v1960_v14 = vld [vmem:[%s4365_s4] sm:$0xff] }
 0x678   :  { %1965 = vperm.xlu0 %3342, %v1960_v14  }
 0x67a   :  { %3132 = vmatpush1.bf16.msra.mxu0 %v3904_v59  ;;  %3164 = vmatpush1.bf16.msra.mxu1 %v3913_v13 }
 0x67b   :  { %3134 = vmatprep.subr.bf16.mxu0 %v3910_v10  ;;  %3166 = vmatprep.subr.bf16.mxu1 %v3919_v12  ;;  %v1962_v10 = vld [vmem:[%s4365_s4 + $0x10] sm:$0xff] }
 0x67c   :  { %1971 = vperm.xlu1 %3343, %v1962_v10  }
 0x67e   :  { %3136 = vmatpush1.bf16.msra.mxu0 %v3916_v57  ;;  %3168 = vmatpush1.bf16.msra.mxu1 %v3925_v15 }
 0x67f   :  { %3138 = vmatprep.subr.bf16.mxu0 %v3922_v6  ;;  %3170 = vmatprep.subr.bf16.mxu1 %v3931_v7  ;;  %v1961_v6 = vld [vmem:[%s4365_s4 + $0x8] sm:$0xff] }
 0x680   :  { %1968 = vperm.xlu0 %3342, %v1961_v6   ;;  %1974 = vperm.xlu1 %3343, %v1963_v0  }
 0x682   :  { %3140 = vmatpush1.bf16.msra.mxu0 %v3928_v9  ;;  %3172 = vmatpush1.bf16.msra.mxu1 %v3935_v50 }
 0x6f7   :  { %v1966_v2 = vpop.permute.xlu0 %1965 }
 0x6f8   :  { %vm1976_vm2 = vcmp.eq.s32.totalorder %v1959_v27, %v1966_v2 }
 0x6f9   :  { %v1980_v1 = vsel %vm1976_vm2, 1.0, %v4401_v5 }
 0x738   :  { %v1692_v33 = vpop.f32.mrb[12].mxu0  ;;  %v1763_v42 = vpop.f32.mrb[12].mxu1 }
 0x739   :  { %v3281_v44 = vadd.f32 %v1692_v33, %v3784_v46  ;;  %v1694_v52 = vpop.f32.mrb[13].mxu0  ;;  %v1765_v56 = vpop.f32.mrb[13].mxu1  ;;  %v3297_v45 = vadd.f32 %v1763_v42, %v3788_v48 }
 0x73a   :  { %v3282_v61 = vadd.f32 %v1694_v52, %v3786_v47  ;;  %v3298_v51 = vadd.f32 %v1765_v56, %v3790_v49  ;;  %v1969_v33 = vpop.permute.xlu0 %1968 }
 0x73b   :  { %v1772_v63 = vmul.f32 0.5, %v3281_v44  ;;  %vm1977_vm5 = vcmp.eq.s32.totalorder %v1959_v27, %v1969_v33 }
 0x73c   :  { %v1776_v38 = vmul.f32 0.5, %v3282_v61  ;;  %v1781_v58 = vmul.f32 0.5, %v3298_v51  ;;  %v1981_v61 = vsel %vm1977_vm5, 1.0, %v4401_v5 }
 0x73d   :  { %3404 = vtanh.f32 %v1772_v63 }
 0x73e   :  { %3406 = vtanh.f32 %v1776_v38 }
 0x73f   :  { %3408 = vtanh.f32 %v3297_v45 }
 0x740   :  { %3410 = vtanh.f32 %v1781_v58 }
 0x747   :  { %v3405_v62 = vpop.eup %3404 }
 0x748   :  { %v3407_v40 = vpop.eup %3406  ;;  %v1774_v41 = vmul.f32 0.5, %v3405_v62 }
 0x749   :  { %v1778_v53 = vmul.f32 0.5, %v3407_v40  ;;  %v3409_v59 = vpop.eup %3408 }
 0x74a   :  { %v1775_v39 = vadd.f32 0.5, %v1774_v41  ;;  %v3411_v15 = vpop.eup %3410 }
 0x74b   :  { %v1779_v37 = vadd.f32 0.5, %v1778_v53  ;;  %v1783_v9 = vmul.f32 0.5, %v3411_v15 }
 0x74c   :  { %v1786_v13 = vmul.f32 %v3409_v59, %v1775_v39 }
 0x74d   :  { %v1785_v57 = vmul.f32 %v1779_v37, %v4192_v16  ;;  %v1784_v7 = vadd.f32 0.5, %v1783_v9 }
 0x74f   :  { %v1787_v12 = vadd.f32 %v1786_v13, %v1785_v57 }
 0x751   :  { %3412 = vtanh.f32 %v1787_v12 }
 0x75b   :  { %v3413_v50 = vpop.eup %3412 }
 0x75c   :  { %v1789_v32 = vmul.f32 %v3413_v50, %v1784_v7 }
 0x75e   :  { %1859 = vmatmul.mubr.f32.vlgmr.msra.gmra.mrb[14].mxu0 %v1789_v32  ;;  %1930 = vmatmul.mubr.f32.vlgmr.msra.gmra.mrb[14].mxu1 %v1789_v32 }
 0x75f   :  { %2550 = vmatprep.mubr.msk.f32.mxu0 %vm1984_vm3, %v1980_v1 }
 0x831   :  { %v1860_v60 = vpop.f32.mrb[14].mxu0  ;;  %v1931_v30 = vpop.f32.mrb[14].mxu1 }
 0x832   :  { %v3283_v43 = vadd.f32 %v1860_v60, %v3784_v46  ;;  %v1862_v3 = vpop.f32.mrb[15].mxu0  ;;  %v1933_v29 = vpop.f32.mrb[15].mxu1  ;;  %v3299_v25 = vadd.f32 %v1931_v30, %v3788_v48 }
 0x833   :  { %v3284_v31 = vadd.f32 %v1862_v3, %v3786_v47  ;;  %v3300_v4 = vadd.f32 %v1933_v29, %v3790_v49  ;;  %v1972_v48 = vpop.permute.xlu1 %1971 }
 0x834   :  { %v1940_v55 = vmul.f32 0.5, %v3283_v43  ;;  %vm1978_vm4 = vcmp.eq.s32.totalorder %v1959_v27, %v1972_v48 }
 0x835   :  { %v1944_v26 = vmul.f32 0.5, %v3284_v31  ;;  %v1949_v16 = vmul.f32 0.5, %v3300_v4  ;;  %v1982_v56 = vsel %vm1978_vm4, 1.0, %v4401_v5 }
 0x836   :  { %3414 = vtanh.f32 %v1940_v55 }
 0x837   :  { %3416 = vtanh.f32 %v1944_v26  ;;  %v1975_v52 = vpop.permute.xlu1 %1974 }
 0x838   :  { %3418 = vtanh.f32 %v3299_v25  ;;  %vm1979_vm6 = vcmp.eq.s32.totalorder %v1959_v27, %v1975_v52 }
 0x839   :  { %3420 = vtanh.f32 %v1949_v16  ;;  %v1983_v63 = vsel %vm1979_vm6, 1.0, %v4401_v5 }
 0x840   :  { %v3415_v11 = vpop.eup %3414 }
 0x841   :  { %v3417_v54 = vpop.eup %3416  ;;  %v1942_v35 = vmul.f32 0.5, %v3415_v11 }
 0x842   :  { %v1946_v28 = vmul.f32 0.5, %v3417_v54  ;;  %v3419_v8 = vpop.eup %3418 }
 0x843   :  { %v1943_v46 = vadd.f32 0.5, %v1942_v35  ;;  %v3421_v6 = vpop.eup %3420 }
 0x844   :  { %v1947_v14 = vadd.f32 0.5, %v1946_v28  ;;  %v1951_v0 = vmul.f32 0.5, %v3421_v6 }
 0x845   :  { %v1954_v10 = vmul.f32 %v3419_v8, %v1943_v46 }
 0x846   :  { %v1953_v47 = vmul.f32 %v1947_v14, %v1787_v12  ;;  %v1952_v42 = vadd.f32 0.5, %v1951_v0 }
 0x848   :  { %v1955_v34 = vadd.f32 %v1954_v10, %v1953_v47 }
 0x84a   :  { %3422 = vtanh.f32 %v1955_v34 }
 0x854   :  { %v3423_v44 = vpop.eup %3422 }
 0x855   :  { %v1957_v49 = vmul.f32 %v3423_v44, %v1952_v42 }
 0x857   :  { %2548 = vmatprep.subr.mxu0 %v1957_v49 }
 0x858   :  { %2549 = vmatpush3.msra.mxu0 %v1957_v49 }
 0x859   :  { %2551 = vmatmul.mubr.msk.f32.vlgmr.msra.gmra.mrb[16].mxu0 %vm1984_vm3, %v1981_v61 }
 0x85a   :  { %2553 = vmatprep.mubr.msk.f32.mxu0 %vm1984_vm3, %v1982_v56 }
 0x85d   :  { %2554 = vmatmul.mubr.msk.f32.gmra.mrb[18].mxu0 %vm1984_vm3, %v1983_v63 }
 0x92c   :  { %v4257_v38 = vpop.f32.mrb[16].mxu0 }
 0x92d   :  { %v4259_v45 = vpop.f32.mrb[17].mxu0 }
 0x930   :  { %v4261_v51 = vpop.f32.mrb[18].mxu0 }
 0x931   :  { %v2073_v58 = vpop.f32.mrb[19].mxu0 }
 0x932   :  { %3500 = dma.done.wait [#allocation6 + $0x1], 2048 }
 0x933   :  { %3501 = vsyncadd [#allocation6 + $0x1], 4294965248  ;;  %v3173_v62 = vpack.c.bf16 %v3701_v18, %v3696_v17  ;;  %v3177_v40 = vpack.c.bf16 %v3711_v20, %v3706_v19  ;;  %2588 = vmatprep.mubr.f32.mxu1 %v2073_v58 }
 0x934   :  { %3502 = dma.done.wait [#allocation6 + $0x2], 2048 }
 0x935   :  { %3503 = vsyncadd [#allocation6 + $0x2], 4294965248  ;;  %3174 = vmatprep.subr.bf16.mxu1 %v3173_v62  ;;  %v3181_v5 = vpack.c.bf16 %v3721_v22, %v3716_v21  ;;  %v2280_v41 = vld [vmem:[%s4369_s8] sm:$0xff]  ;;  %v2281_v17 = vld [vmem:[%s4369_s8 + $0x8] sm:$0xff]  ;;  %v3185_v19 = vpack.c.bf16 %v3731_v24, %v3726_v23  ;;  %vm2389_vm7 = vcmask 261120   ;;  %vm2413_vm8 = vcmask 7168  }
 0x936   :  { %3176 = vmatpush3.bf16.msra.mxu1 %v3173_v62  ;;  %v2282_v18 = vld [vmem:[%s4369_s8 + $0x10] sm:$0xff]  ;;  %v3237_v20 = vpack.c.bf16 %v2281_v17, %v2280_v41  ;;  %v2283_v21 = vld [vmem:[%s4369_s8 + $0x18] sm:$0xff]  ;;  %v2284_v53 = vld [vmem:[%s4369_s8 + $0x20] sm:$0xff] }
 0x937   :  { %3178 = vmatprep.subr.bf16.mxu1 %v3177_v40  ;;  %v3241_v22 = vpack.c.bf16 %v2283_v21, %v2282_v18  ;;  %v2285_v39 = vld [vmem:[%s4369_s8 + $0x28] sm:$0xff]  ;;  %v4403_v59 = vld [vmem:[#allocation39_spill] sm:$0xff]  ;;  %v4404_v23 = vld [vmem:[#allocation40_spill] sm:$0xff] }
 0x938   :  { %3238 = vmatprep.subr.bf16.mxu0 %v3237_v20  ;;  %v3189_v24 = vpack.c.bf16 %v4404_v23, %v4403_v59  ;;  %v3245_v37 = vpack.c.bf16 %v2285_v39, %v2284_v53  ;;  %v2286_v13 = vld [vmem:[%s4369_s8 + $0x30] sm:$0xff]  ;;  %v2287_v57 = vld [vmem:[%s4369_s8 + $0x38] sm:$0xff]  ;;  %v4405_v12 = vld [vmem:[#allocation41_spill] sm:$0xff] }
 0x939   :  { %3240 = vmatpush3.bf16.msra.mxu0 %v3237_v20  ;;  %v4406_v15 = vld [vmem:[#allocation42_spill] sm:$0xff]  ;;  %v3249_v7 = vpack.c.bf16 %v2287_v57, %v2286_v13  ;;  %v2288_v50 = vld [vmem:[%s4369_s8 + $0x40] sm:$0xff]  ;;  %v4407_v36 = vld [vmem:[#allocation43_spill] sm:$0xff] }
 0x93a   :  { %3180 = vmatpush3.bf16.msra.mxu1 %v3177_v40  ;;  %3242 = vmatprep.subr.bf16.mxu0 %v3241_v22  ;;  %v3193_v9 = vpack.c.bf16 %v4406_v15, %v4405_v12  ;;  %v2289_v32 = vld [vmem:[%s4369_s8 + $0x48] sm:$0xff]  ;;  %v4408_v27 = vld [vmem:[#allocation44_spill] sm:$0xff]  ;;  %v2290_v60 = vld [vmem:[%s4369_s8 + $0x50] sm:$0xff] }
 0x93b   :  { %3182 = vmatprep.subr.bf16.mxu1 %v3181_v5  ;;  %v3197_v2 = vpack.c.bf16 %v4408_v27, %v4407_v36  ;;  %v3253_v1 = vpack.c.bf16 %v2289_v32, %v2288_v50  ;;  %v2291_v30 = vld [vmem:[%s4369_s8 + $0x58] sm:$0xff]  ;;  %v4409_v43 = vld [vmem:[#allocation45_spill] sm:$0xff]  ;;  %v4410_v3 = vld [vmem:[#allocation46_spill] sm:$0xff] }
 0x93c   :  { %v3201_v29 = vpack.c.bf16 %v4410_v3, %v4409_v43  ;;  %v3257_v31 = vpack.c.bf16 %v2291_v30, %v2290_v60  ;;  %v2292_v55 = vld [vmem:[%s4369_s8 + $0x60] sm:$0xff]  ;;  %v2293_v26 = vld [vmem:[%s4369_s8 + $0x68] sm:$0xff]  ;;  %v4411_v25 = vld [vmem:[#allocation23_spill] sm:$0xff] }
 0x93d   :  { %3244 = vmatpush3.bf16.msra.mxu0 %v3241_v22  ;;  %v4412_v4 = vld [vmem:[#allocation24_spill] sm:$0xff]  ;;  %v3261_v11 = vpack.c.bf16 %v2293_v26, %v2292_v55  ;;  %v4413_v54 = vld [vmem:[#allocation25_spill] sm:$0xff]  ;;  %v4414_v35 = vld [vmem:[#allocation26_spill] sm:$0xff] }
 0x93e   :  { %3184 = vmatpush3.bf16.msra.mxu1 %v3181_v5  ;;  %3246 = vmatprep.subr.bf16.mxu0 %v3245_v37  ;;  %v3205_v16 = vpack.c.bf16 %v4412_v4, %v4411_v25  ;;  %v3209_v28 = vpack.c.bf16 %v4414_v35, %v4413_v54  ;;  %v4415_v46 = vld [vmem:[#allocation27_spill] sm:$0xff]  ;;  %v4416_v8 = vld [vmem:[#allocation28_spill] sm:$0xff]  ;;  %v4417_v10 = vld [vmem:[#allocation29_spill] sm:$0xff] }
 0x93f   :  { %3186 = vmatprep.subr.bf16.mxu1 %v3185_v19  ;;  %v3213_v14 = vpack.c.bf16 %v4416_v8, %v4415_v46  ;;  %v4418_v47 = vld [vmem:[#allocation30_spill] sm:$0xff]  ;;  %v4419_v6 = vld [vmem:[#allocation31_spill] sm:$0xff]  ;;  %v4420_v0 = vld [vmem:[#allocation32_spill] sm:$0xff] }
 0x940   :  { %v3217_v34 = vpack.c.bf16 %v4418_v47, %v4417_v10  ;;  %v3221_v48 = vpack.c.bf16 %v4420_v0, %v4419_v6  ;;  %v4421_v33 = vld [vmem:[#allocation33_spill] sm:$0xff]  ;;  %v4422_v42 = vld [vmem:[#allocation34_spill] sm:$0xff]  ;;  %v4423_v49 = vld [vmem:[#allocation35_spill] sm:$0xff] }
 0x941   :  { %3248 = vmatpush3.bf16.msra.mxu0 %v3245_v37  ;;  %v3225_v44 = vpack.c.bf16 %v4422_v42, %v4421_v33  ;;  %v4424_v52 = vld [vmem:[#allocation36_spill] sm:$0xff]  ;;  %v4425_v61 = vld [vmem:[#allocation37_spill] sm:$0xff]  ;;  %v4426_v63 = vld [vmem:[#allocation38_spill] sm:$0xff] }
 0x942   :  { %3188 = vmatpush3.bf16.msra.mxu1 %v3185_v19  ;;  %3250 = vmatprep.subr.bf16.mxu0 %v3249_v7  ;;  %v3229_v56 = vpack.c.bf16 %v4424_v52, %v4423_v49  ;;  %v2295_v58 = vld [vmem:[%s4369_s8 + $0x78] sm:$0xff]  ;;  %v2482_v40 = vld [vmem:[%s4368_s7] ss:$0 sm:$0xff] }
 0x943   :  { %3190 = vmatprep.subr.bf16.mxu1 %v3189_v24  ;;  %v2483_v20 = vld [vmem:[%s4370_s9] ss:$0 sm:$0xff] }
 0x944   :  { %v2484_v59 = vld [vmem:[%s4371_s10] ss:$0 sm:$0xff] }
 0x945   :  { %3252 = vmatpush3.bf16.msra.mxu0 %v3249_v7  ;;  %v2485_v15 = vld [vmem:[#allocation7] ss:$0 sm:$0xff] }
 0x946   :  { %3192 = vmatpush3.bf16.msra.mxu1 %v3189_v24  ;;  %3254 = vmatprep.subr.bf16.mxu0 %v3253_v1 }
 0x947   :  { %3194 = vmatprep.subr.bf16.mxu1 %v3193_v9 }
 0x949   :  { %3256 = vmatpush3.bf16.msra.mxu0 %v3253_v1 }
 0x94a   :  { %3196 = vmatpush3.bf16.msra.mxu1 %v3193_v9  ;;  %3258 = vmatprep.subr.bf16.mxu0 %v3257_v31 }
 0x94b   :  { %3198 = vmatprep.subr.bf16.mxu1 %v3197_v2 }
 0x94d   :  { %3260 = vmatpush3.bf16.msra.mxu0 %v3257_v31 }
 0x94e   :  { %3200 = vmatpush3.bf16.msra.mxu1 %v3197_v2  ;;  %3262 = vmatprep.subr.bf16.mxu0 %v3261_v11 }
 0x94f   :  { %3202 = vmatprep.subr.bf16.mxu1 %v3201_v29 }
 0x951   :  { %3264 = vmatpush3.bf16.msra.mxu0 %v3261_v11 }
 0x952   :  { %3204 = vmatpush3.bf16.msra.mxu1 %v3201_v29 }
 0x953   :  { %3206 = vmatprep.subr.bf16.mxu1 %v3205_v16 }
 0x955   :  { %2589 = vmatmul.mubr.f32.vlgmr.msra.gmra.mrb[16].mxu1 %v4261_v51  ;;  %v2294_v51 = vld [vmem:[%s4369_s8 + $0x70] sm:$0xff] }
 0x956   :  { %3208 = vmatpush3.bf16.msra.mxu1 %v3205_v16  ;;  %2623 = vmatprep.mubr.f32.mxu1 %v4259_v45  ;;  %v3233_v45 = vpack.c.bf16 %v4426_v63, %v4425_v61  ;;  %v3265_v62 = vpack.c.bf16 %v2295_v58, %v2294_v51 }
 0x957   :  { %3210 = vmatprep.subr.bf16.mxu1 %v3209_v28 }
 0x958   :  { %3266 = vmatprep.subr.bf16.mxu0 %v3265_v62 }
 0x959   :  { %3268 = vmatpush3.bf16.msra.mxu0 %v3265_v62 }
 0x95a   :  { %3212 = vmatpush3.bf16.msra.mxu1 %v3209_v28 }
 0x95b   :  { %3214 = vmatprep.subr.bf16.mxu1 %v3213_v14 }
 0x95e   :  { %3216 = vmatpush3.bf16.msra.mxu1 %v3213_v14 }
 0x95f   :  { %3218 = vmatprep.subr.bf16.mxu1 %v3217_v34 }
 0x962   :  { %3220 = vmatpush3.bf16.msra.mxu1 %v3217_v34 }
 0x963   :  { %3222 = vmatprep.subr.bf16.mxu1 %v3221_v48 }
 0x966   :  { %3224 = vmatpush3.bf16.msra.mxu1 %v3221_v48 }
 0x967   :  { %3226 = vmatprep.subr.bf16.mxu1 %v3225_v44 }
 0x96a   :  { %3228 = vmatpush3.bf16.msra.mxu1 %v3225_v44 }
 0x96b   :  { %3230 = vmatprep.subr.bf16.mxu1 %v3229_v56 }
 0x96e   :  { %3232 = vmatpush3.bf16.msra.mxu1 %v3229_v56 }
 0x96f   :  { %3234 = vmatprep.subr.bf16.mxu1 %v3233_v45 }
 0x972   :  { %3236 = vmatpush3.bf16.msra.mxu1 %v3233_v45 }
 0x975   :  { %2624 = vmatmul.mubr.f32.vlgmr.msra.gmra.mrb[16].mxu1 %v4257_v38 }
 0xa48   :  { %v2625_v5 = vpop.f32.mrb[16].mxu1 }
 0xa49   :  { %v2277_v41 = vadd.f32 %v2625_v5, %v2482_v40  ;;  %v2260_v17 = vpop.f32.mrb[17].mxu1 }
 0xa4a   :  { %v2276_v18 = vadd.f32 %v2482_v40, %v2260_v17 }
 0xa4b   :  { %v2279_v19 = vmax.f32 %v2277_v41, 0.0 }
 0xa4c   :  { %v2278_v38 = vmax.f32 %v2276_v18, 0.0 }
 0xa4e   :  { %2658 = vmatprep.mubr.f32.mxu0 %v2278_v38 }
 0xa4f   :  { %2659 = vmatmul.mubr.f32.vlgmr.msra.gmra.mrb[20].mxu0 %v2279_v19 }
 0xb22   :  { %v2660_v21 = vpop.f32.mrb[20].mxu0 }
 0xb23   :  { %v2375_v22 = vadd.f32 %v2660_v21, %v2483_v20  ;;  %v2369_v53 = vpop.f32.mrb[21].mxu0 }
 0xb24   :  { %v2370_v39 = vadd.f32 %v2483_v20, %v2369_v53 }
 0xb25   :  { %v2379_v23 = vmax.f32 %v2375_v22, 0.0 }
 0xb26   :  { %v2378_v24 = vmax.f32 %v2370_v39, 0.0 }
 0xb27   :  { %v2388_v57 = vmul.f32 %v2484_v59, %v2379_v23 }
 0xb28   :  { %v2387_v37 = vmul.f32 %v2484_v59, %v2378_v24 }
 0xb29   :  { %v2393_v12 = vsel %vm2389_vm7, %v2388_v57, 0.0 }
 0xb2a   :  { %v2390_v13 = vsel %vm2389_vm7, %v2387_v37, 0.0 }
 0xb2b   :  { %2391 = vadd.xlane.f32.xlu0 %v2390_v13 }
 0xb2f   :  { %2394 = vadd.xlane.f32.xlu0 %v2393_v12 }
 0xbb8   :  { %v2392_v9 = vpop.xlane.xlu0 %2391 }
 0xbb9   :  { %v2403_v7 = vadd.f32 %v2485_v15, %v2392_v9 }
 0xbbb   :  { %v2405_v50 = vmul.f32 0.5, %v2403_v7 }
 0xbbc   :  { %v2395_v32 = vpop.xlane.xlu0 %2394 }
 0xbbd   :  { %3424 = vtanh.f32 %v2405_v50  ;;  %v2404_v36 = vadd.f32 %v2485_v15, %v2395_v32 }
 0xbbf   :  { %v2406_v27 = vmul.f32 0.5, %v2404_v36 }
 0xbc1   :  { %3426 = vtanh.f32 %v2406_v27 }
 0xbc7   :  { %v3425_v2 = vpop.eup %3424 }
 0xbc8   :  { %v2409_v1 = vmul.f32 0.5, %v3425_v2 }
 0xbca   :  { %v2411_v60 = vadd.f32 0.5, %v2409_v1 }
 0xbcb   :  { %v3427_v30 = vpop.eup %3426 }
 0xbcc   :  { %2414 = vst.msk [vmem:[%s4373_s12] sm:$0xff] %vm2413_vm8, %v2411_v60  ;;  %v2410_v43 = vmul.f32 0.5, %v3427_v30 }
 0xbce   :  { %v2412_v3 = vadd.f32 0.5, %v2410_v43 }
 0xbd0   :  { %2415 = vst.msk [vmem:[%s4373_s12 + $0x8] sm:$0xff] %vm2413_vm8, %v2412_v3 }
 0xbd1   :  { %2420 = vsyncpa [#allocation9], 1 }
 0xbd2   :  { %2421 = vsyncpa [#allocation11], 1 }
 0xbd3   :  { %2422 = vsyncmov [#allocation6] }
 0xbd6   :  { %s2423_s25 = vpop.sfrf %2422 }
 0xbd7   :  { %p2486_p10 = scmp.ne.s32.totalorder %s2423_s25, 0 }
 0xbd9   :  { %2427 = shalt.err (%p2486_p10)  }
 0xbda   :  { %2429 = vsyncmov [#allocation6 + $0x1] }
 0xbdd   :  { %s2430_s27 = vpop.sfrf %2429 }
 0xbde   :  { %p2487_p11 = scmp.ne.s32.totalorder %s2430_s27, 0 }
 0xbe0   :  { %2434 = shalt.err (%p2487_p11)  }
 0xbe1   :  { %2436 = vsyncmov [#allocation6 + $0x2] }
 0xbe4   :  { %s2437_s1 = vpop.sfrf %2436 }
 0xbe5   :  { %p2488_p12 = scmp.ne.s32.totalorder %s2437_s1, 0 }
 0xbe7   :  { %2441 = shalt.err (%p2488_p12)  }

</bundles_post_ra>
